<compile_context>
chip_gen: v7x
topology: tpu7x:2x2x1
jax: 0.10.0
libtpu: 0.0.40
codegen_flags: <defaults>
</compile_context>

<pallas_src>
import functools

import jax
import jax.numpy as jnp
import numpy as np
from jax.experimental import pallas as pl
from jax.experimental.pallas import tpu as pltpu

GUARD = 128          # per-image front/back lane guard; must be >= W + 2
C_ALIGN = 8          # channel padding granularity (f32 sublane tile)


def _round_up(a, b):
    return (a + b - 1) // b * b


def _compiler_params():
    try:
        cap = getattr(pltpu.get_tpu_info(), "vmem_capacity_bytes", 64 << 20)
    except Exception:                      # no TPU info -> stay conservative
        cap = 64 << 20
    limit = max(32 << 20, min(int(cap * 0.7), 96 << 20))
    return pltpu.CompilerParams(dimension_semantics=("parallel",),
                                vmem_limit_bytes=int(limit))


# ----------------------------------------------------------------------------
# Pallas kernels
# ----------------------------------------------------------------------------
def _entry1x1_kernel(x_ref, w_ref, b_ref, o0_ref, o1_ref):
    """cv1: 1x1 conv + folded-BN bias + SiLU on one image, read straight from
    the NCHW input.  Writes the two channel chunks as separate guarded
    per-image segments (zero halo laid down here, once)."""
    hw = x_ref.shape[1]
    cp, pg = o0_ref.shape
    x = x_ref[...].astype(jnp.bfloat16)                          # (c1, HW)
    y = jnp.dot(w_ref[...], x, preferred_element_type=jnp.float32)
    y = y + b_ref[...]
    y = (y * jax.nn.sigmoid(y)).astype(jnp.bfloat16)             # (2cp, HW)
    zf = jnp.zeros((cp, GUARD), jnp.bfloat16)
    zb = jnp.zeros((cp, pg - GUARD - hw), jnp.bfloat16)
    for o_ref, chunk in ((o0_ref, y[:cp]), (o1_ref, y[cp:])):
        o_ref[:, :GUARD] = zf
        o_ref[:, GUARD:GUARD + hw] = chunk
        o_ref[:, GUARD + hw:] = zb


def _bottleneck_kernel(W, add, x_ref, w1_ref, b1_ref, w2_ref, b2_ref,
                       mask_ref, o_ref, mid_ref):
    """Fused Bottleneck: 3x3 conv+BN+SiLU -> 3x3 conv+BN+SiLU (+ residual).
    Input/output are guarded per-image (cp, GUARD + P + GUARD) slabs; the
    intermediate activation stays in the VMEM scratch `mid_ref`."""
    cp = o_ref.shape[0]
    P = mask_ref.shape[1]
    valid = mask_ref[0:1, :]   # 1 where flat pixel < H*W (zeros ring/tail)
    m_l = mask_ref[1:2, :]     # 1 where col != 0      (dx = -1 taps)
    m_r = mask_ref[2:3, :]     # 1 where col != W - 1  (dx = +1 taps)

    def conv3x3(src_ref, w_ref, b_ref):
        # 9 tap matmuls accumulated in f32 (no im2col buffer), grouped by dx
        # so the horizontal-edge masks are applied only twice.
        accs = []
        for dx in (-1, 0, 1):
            acc = jnp.zeros((cp, P), jnp.float32)
            for dy in (-1, 0, 1):
                t = (dy + 1) * 3 + (dx + 1)
                off = GUARD + dy * W + dx
                acc = acc + jnp.dot(w_ref[:, t * cp:(t + 1) * cp],
                                    src_ref[:, off:off + P],
                                    preferred_element_type=jnp.float32)
            accs.append(acc)
        y = accs[1] + accs[0] * m_l + accs[2] * m_r + b_ref[...]
        return (y * jax.nn.sigmoid(y)) * valid                    # f32

    zg = jnp.zeros((cp, GUARD), jnp.bfloat16)

    mid = conv3x3(x_ref, w1_ref, b1_ref)
    mid_ref[:, :GUARD] = zg
    mid_ref[:, GUARD + P:] = zg
    mid_ref[:, GUARD:GUARD + P] = mid.astype(jnp.bfloat16)

    out = conv3x3(mid_ref, w2_ref, b2_ref)
    if add:                                                       # residual in f32
        out = out + x_ref[:, GUARD:GUARD + P].astype(jnp.float32)
    o_ref[:, :GUARD] = zg
    o_ref[:, GUARD + P:] = zg
    o_ref[:, GUARD:GUARD + P] = out.astype(o_ref.dtype)


def _concat1x1_kernel(n_seg, *refs):
    """Fused torch.cat + cv2 1x1 conv + BN + SiLU: K-split dot over the branch
    segments; writes the NCHW-shaped f32 output directly."""
    ys = refs[:n_seg]
    w_ref, b_ref, o_ref = refs[n_seg:n_seg + 3]
    c2p, hw = o_ref.shape
    cp = ys[0].shape[0]
    acc = jnp.zeros((c2p, hw), jnp.float32)
    for s in range(n_seg):
        acc = acc + jnp.dot(w_ref[:, s * cp:(s + 1) * cp],
                            ys[s][:, GUARD:GUARD + hw],
                            preferred_element_type=jnp.float32)
    y = acc + b_ref[...]
    o_ref[...] = (y * jax.nn.sigmoid(y)).astype(o_ref.dtype)


# ----------------------------------------------------------------------------
# C2f forward (matches the PyTorch module semantics, eval-mode BN)
# ----------------------------------------------------------------------------
def _edge_masks(W, HW, P):
    q = np.arange(P)
    col = q % W
    m = np.zeros((8, P), np.float32)
    m[0] = q < HW
    m[1] = col != 0
    m[2] = col != W - 1
    return jnp.asarray(m)


def c2f_forward(x_nchw, params, shortcut=False):
    N, c1, H, W = x_nchw.shape
    HW = H * W
    P = _round_up(HW, 128)
    Pg = GUARD + P + GUARD
    assert W + 2 <= GUARD, "TODO(synk): row-aligned guarded layout for W > 126"
    cp, c2p, c2 = params["cp"], params["c2p"], params["c2"]
    cparams = _compiler_params()

    seg_shape = jax.ShapeDtypeStruct((N, cp, Pg), jnp.bfloat16)
    seg_spec = pl.BlockSpec((None, cp, Pg), lambda n: (n, 0, 0))
    masks = _edge_masks(W, HW, P)

    # ---- cv1: 1x1 conv reading the NCHW input directly, emits the 2 chunks --
    y0, y1 = pl.pallas_call(
        _entry1x1_kernel,
        out_shape=(seg_shape, seg_shape),
        grid=(N,),
        in_specs=[
            pl.BlockSpec((None, c1, HW), lambda n: (n, 0, 0)),
            pl.BlockSpec((2 * cp, c1), lambda n: (0, 0)),
            pl.BlockSpec((2 * cp, 1), lambda n: (0, 0)),
        ],
        out_specs=(seg_spec, seg_spec),
        compiler_params=cparams,
    )(x_nchw.reshape(N, c1, HW), params["cv1"]["w"], params["cv1"]["b"])

    # ---- n fused Bottleneck blocks (both 3x3 convs in one pallas_call) ------
    ys = [y0, y1]
    for blk in params["m"]:
        t = pl.pallas_call(
            functools.partial(_bottleneck_kernel, W, shortcut),
            out_shape=seg_shape,
            grid=(N,),
            in_specs=[
                seg_spec,
                pl.BlockSpec((cp, 9 * cp), lambda n: (0, 0)),
                pl.BlockSpec((cp, 1), lambda n: (0, 0)),
                pl.BlockSpec((cp, 9 * cp), lambda n: (0, 0)),
                pl.BlockSpec((cp, 1), lambda n: (0, 0)),
                pl.BlockSpec((8, P), lambda n: (0, 0)),
            ],
            out_specs=seg_spec,
            scratch_shapes=[pltpu.VMEM((cp, Pg), jnp.bfloat16)],
            compiler_params=cparams,
        )(ys[-1], blk["cv1"]["w"], blk["cv1"]["b"],
          blk["cv2"]["w"], blk["cv2"]["b"], masks)
        ys.append(t)

    # ---- fused concat + cv2 1x1, writes NCHW-shaped f32 output directly -----
    n_seg = len(ys)
    out = pl.pallas_call(
        functools.partial(_concat1x1_kernel, n_seg),
        out_shape=jax.ShapeDtypeStruct((N, c2p, HW), jnp.float32),
        grid=(N,),
        in_specs=[seg_spec] * n_seg + [
            pl.BlockSpec((c2p, n_seg * cp), lambda n: (0, 0)),
            pl.BlockSpec((c2p, 1), lambda n: (0, 0)),
        ],
        out_specs=pl.BlockSpec((None, c2p, HW), lambda n: (n, 0, 0)),
        compiler_params=cparams,
    )(*ys, params["cv2"]["w"], params["cv2"]["b"])

    return out[:, :c2, :].reshape(N, c2, H, W)


# ----------------------------------------------------------------------------
# Parameter init (raw, PyTorch-like) + offline kernel-ready preparation
# ----------------------------------------------------------------------------
def _fold_bn(bn, eps=1e-5):
    scale = bn["gamma"] / jnp.sqrt(bn["var"] + eps)
    bias = bn["beta"] - bn["mean"] * scale
    return scale, bias


def _prep_entry(p, c, cp):
    """cv1 (c1 -> 2c) 1x1: fold BN, pad each output chunk to cp rows."""
    scale, bias = _fold_bn(p["bn"])
    w = p["w"][:, :, 0, 0] * scale[:, None]                      # (2c, c1)
    c1 = w.shape[1]
    wp = jnp.zeros((2 * cp, c1), jnp.float32)
    bp = jnp.zeros((2 * cp,), jnp.float32)
    wp = wp.at[:c].set(w[:c]).at[cp:cp + c].set(w[c:])
    bp = bp.at[:c].set(bias[:c]).at[cp:cp + c].set(bias[c:])
    return {"w": wp.astype(jnp.bfloat16), "b": bp.reshape(-1, 1)}


def _prep_3x3(p, cp):
    """3x3 conv: fold BN, lay the 9 taps out as (cp, 9*cp) column blocks."""
    scale, bias = _fold_bn(p["bn"])
    w = p["w"] * scale[:, None, None, None]                      # (c, c, 3, 3)
    c_out, c_in = w.shape[0], w.shape[1]
    wp = jnp.zeros((cp, 9 * cp), jnp.float32)
    for dy in (-1, 0, 1):
        for dx in (-1, 0, 1):
            t = (dy + 1) * 3 + (dx + 1)
            wp = wp.at[:c_out, t * cp:t * cp + c_in].set(w[:, :, dy + 1, dx + 1])
    bp = jnp.zeros((cp,), jnp.float32).at[:c_out].set(bias)
    return {"w": wp.astype(jnp.bfloat16), "b": bp.reshape(-1, 1)}


def _prep_final(p, c, cp, n_seg, c2p):
    """cv2 ((2+n)c -> c2) 1x1: fold BN, pad each input segment to cp columns."""
    scale, bias = _fold_bn(p["bn"])
    w = p["w"][:, :, 0, 0] * scale[:, None]                      # (c2, n_seg*c)
    c2 = w.shape[0]
    wp = jnp.zeros((c2p, n_seg * cp), jnp.float32)
    for s in range(n_seg):
        wp = wp.at[:c2, s * cp:s * cp + c].set(w[:, s * c:(s + 1) * c])
    bp = jnp.zeros((c2p,), jnp.float32).at[:c2].set(bias)
    return {"w": wp.astype(jnp.bfloat16), "b": bp.reshape(-1, 1)}


def prepare_c2f_params(params):
    """Offline: fold eval-mode BN into bf16 weights, pad channels to C_ALIGN."""
    c = params["cv1"]["w"].shape[0] // 2
    c2 = params["cv2"]["w"].shape[0]
    n = len(params["m"])
    cp, c2p = _round_up(c, C_ALIGN), _round_up(c2, C_ALIGN)
    return {
        "c": c, "c2": c2, "cp": cp, "c2p": c2p,
        "cv1": _prep_entry(params["cv1"], c, cp),
        "cv2": _prep_final(params["cv2"], c, cp, 2 + n, c2p),
        "m": [{"cv1": _prep_3x3(b["cv1"], cp), "cv2": _prep_3x3(b["cv2"], cp)}
              for b in params["m"]],
    }


def _init_conv_bn(key, c_in, c_out, k):
    kw, kb, kg, km, kv = jax.random.split(key, 5)
    return {
        "w": 0.1 * jax.random.normal(kw, (c_out, c_in, k, k), jnp.float32),
        "bn": {
            "gamma": jax.random.uniform(kg, (c_out,), jnp.float32, 0.5, 1.5),
            "beta": 0.1 * jax.random.normal(kb, (c_out,), jnp.float32),
            "mean": 0.1 * jax.random.normal(km, (c_out,), jnp.float32),
            "var": jax.random.uniform(kv, (c_out,), jnp.float32, 0.5, 1.5),
        },
    }


def init_c2f(key, c1, c2, n=1, e=0.5):
    c = int(c2 * e)
    keys = jax.random.split(key, 2 + 2 * n)
    params = {
        "cv1": _init_conv_bn(keys[0], c1, 2 * c, 1),
        "cv2": _init_conv_bn(keys[1], (2 + n) * c, c2, 1),
        "m": [],
    }
    for i in range(n):
        params["m"].append({
            "cv1": _init_conv_bn(keys[2 + 2 * i], c, c, 3),
            "cv2": _init_conv_bn(keys[3 + 2 * i], c, c, 3),
        })
    return params


# ----------------------------------------------------------------------------
# Pure-JAX f32 reference (correctness check only)
# ----------------------------------------------------------------------------
def _ref_conv_module(x_nhwc, p):
    w = p["w"]
    k = w.shape[-1]
    pad = k // 2
    w_hwio = jnp.transpose(w, (2, 3, 1, 0))
    y = jax.lax.conv_general_dilated(
        x_nhwc, w_hwio, (1, 1), [(pad, pad), (pad, pad)],
        dimension_numbers=("NHWC", "HWIO", "NHWC"))
    scale, bias = _fold_bn(p["bn"])
    y = y * scale + bias
    return y * jax.nn.sigmoid(y)


def _ref_c2f(x_nchw, params, shortcut=False):
    x = jnp.transpose(x_nchw, (0, 2, 3, 1))
    c = params["cv1"]["w"].shape[0] // 2
    y = _ref_conv_module(x, params["cv1"])
    ys = [y[..., :c], y[..., c:]]
    for blk in params["m"]:
        t = _ref_conv_module(ys[-1], blk["cv1"])
        t = _ref_conv_module(t, blk["cv2"])
        if shortcut:
            t = ys[-1] + t
        ys.append(t)
    cat = jnp.concatenate(ys, axis=-1)
    out = _ref_conv_module(cat, params["cv2"])
    return jnp.transpose(out, (0, 3, 1, 2))


if __name__ == "__main__":
    key = jax.random.PRNGKey(0)
    kx, kp = jax.random.split(key)

    # C2f(c1=4, c2=8, n=1, shortcut=False, e=0.5)  -> hidden c = 4
    N, c1, c2, H, W = 2, 4, 8, 16, 16
    n, shortcut = 1, False

    x = jax.random.normal(kx, (N, c1, H, W), jnp.float32)        # NCHW like PyTorch
    params = init_c2f(kp, c1, c2, n=n)
    prep = prepare_c2f_params(params)                            # offline: fold BN, pad, bf16

    fwd = jax.jit(functools.partial(c2f_forward, params=prep, shortcut=shortcut))
    out = jax.block_until_ready(fwd(x))

    assert out.shape == (N, c2, H, W)
    ref = _ref_c2f(x, params, shortcut=shortcut)
    np.testing.assert_allclose(np.asarray(out), np.asarray(ref),
                               rtol=5e-2, atol=5e-2)
    print("KERNEL_OK")
</pallas_src>

<mosaic_0001>
module attributes {stable_mosaic.version = 11 : i64} {
  func.func @_bottleneck_kernel(%arg0: i32, %arg1: memref<1x8x512xbf16, #tpu.memory_space<vmem>>, %arg2: memref<8x72xbf16, #tpu.memory_space<vmem>>, %arg3: memref<8x1xf32, #tpu.memory_space<vmem>>, %arg4: memref<8x72xbf16, #tpu.memory_space<vmem>>, %arg5: memref<8x1xf32, #tpu.memory_space<vmem>>, %arg6: memref<8x256xf32, #tpu.memory_space<vmem>>, %arg7: memref<1x8x512xbf16, #tpu.memory_space<vmem>>, %arg8: memref<8x512xbf16, #tpu.memory_space<vmem>>) attributes {dimension_semantics = [#tpu.dimension_semantics<parallel>], iteration_bounds = array<i64: 2>, scalar_prefetch = 0 : i64, scratch_operands = 1 : i64, tpu.core_type = #tpu.core_type<tc>, window_params = [{transform_indices = @transform_0, window_bounds = array<i64: 1, 8, 512>}, {pipeline_mode = #tpu.pipeline_mode<synchronous>, transform_indices = @transform_1, window_bounds = array<i64: 8, 72>}, {pipeline_mode = #tpu.pipeline_mode<synchronous>, transform_indices = @transform_2, window_bounds = array<i64: 8, 1>}, {pipeline_mode = #tpu.pipeline_mode<synchronous>, transform_indices = @transform_3, window_bounds = array<i64: 8, 72>}, {pipeline_mode = #tpu.pipeline_mode<synchronous>, transform_indices = @transform_4, window_bounds = array<i64: 8, 1>}, {pipeline_mode = #tpu.pipeline_mode<synchronous>, transform_indices = @transform_5, window_bounds = array<i64: 8, 256>}, {transform_indices = @transform_6, window_bounds = array<i64: 1, 8, 512>}]} {
    %c0 = arith.constant 0 : index
    %c0_0 = arith.constant 0 : index
    %0 = vector.load %arg6[%c0, %c0_0] : memref<8x256xf32, #tpu.memory_space<vmem>>, vector<1x256xf32>
    %c1 = arith.constant 1 : index
    %c0_1 = arith.constant 0 : index
    %1 = vector.load %arg6[%c1, %c0_1] : memref<8x256xf32, #tpu.memory_space<vmem>>, vector<1x256xf32>
    %c2 = arith.constant 2 : index
    %c0_2 = arith.constant 0 : index
    %2 = vector.load %arg6[%c2, %c0_2] : memref<8x256xf32, #tpu.memory_space<vmem>>, vector<1x256xf32>
    %cst = arith.constant 0.000000e+00 : bf16
    %3 = vector.broadcast %cst : bf16 to vector<8x128xbf16>
    %cst_3 = arith.constant 0.000000e+00 : f32
    %4 = vector.broadcast %cst_3 : f32 to vector<8x256xf32>
    %c0_4 = arith.constant 0 : index
    %c0_5 = arith.constant 0 : index
    %5 = vector.load %arg2[%c0_4, %c0_5] : memref<8x72xbf16, #tpu.memory_space<vmem>>, vector<8x8xbf16>
    %c0_6 = arith.constant 0 : index
    %c0_7 = arith.constant 0 : index
    %c111 = arith.constant 111 : index
    %6 = vector.load %arg1[%c0_6, %c0_7, %c111] : memref<1x8x512xbf16, #tpu.memory_space<vmem>>, vector<1x8x256xbf16>
    %7 = vector.shape_cast %6 : vector<1x8x256xbf16> to vector<8x256xbf16>
    %cst_8 = arith.constant dense<0.000000e+00> : vector<8x256xf32>
    %8 = tpu.matmul %5, %7, %cst_8 {dimension_numbers = #tpu.dot_dimension_numbers<[1], [0], [0], [1], [0, 0, 1, 1], [], []>} : vector<8x8xbf16>, vector<8x256xbf16>, vector<8x256xf32> -> vector<8x256xf32>
    %9 = arith.addf %4, %8 : vector<8x256xf32>
    %c0_9 = arith.constant 0 : index
    %c24 = arith.constant 24 : index
    %10 = vector.load %arg2[%c0_9, %c24] : memref<8x72xbf16, #tpu.memory_space<vmem>>, vector<8x8xbf16>
    %c0_10 = arith.constant 0 : index
    %c0_11 = arith.constant 0 : index
    %c127 = arith.constant 127 : index
    %11 = vector.load %arg1[%c0_10, %c0_11, %c127] : memref<1x8x512xbf16, #tpu.memory_space<vmem>>, vector<1x8x256xbf16>
    %12 = vector.shape_cast %11 : vector<1x8x256xbf16> to vector<8x256xbf16>
    %cst_12 = arith.constant dense<0.000000e+00> : vector<8x256xf32>
    %13 = tpu.matmul %10, %12, %cst_12 {dimension_numbers = #tpu.dot_dimension_numbers<[1], [0], [0], [1], [0, 0, 1, 1], [], []>} : vector<8x8xbf16>, vector<8x256xbf16>, vector<8x256xf32> -> vector<8x256xf32>
    %14 = arith.addf %9, %13 : vector<8x256xf32>
    %c0_13 = arith.constant 0 : index
    %c48 = arith.constant 48 : index
    %15 = vector.load %arg2[%c0_13, %c48] : memref<8x72xbf16, #tpu.memory_space<vmem>>, vector<8x8xbf16>
    %c0_14 = arith.constant 0 : index
    %c0_15 = arith.constant 0 : index
    %c143 = arith.constant 143 : index
    %16 = vector.load %arg1[%c0_14, %c0_15, %c143] : memref<1x8x512xbf16, #tpu.memory_space<vmem>>, vector<1x8x256xbf16>
    %17 = vector.shape_cast %16 : vector<1x8x256xbf16> to vector<8x256xbf16>
    %cst_16 = arith.constant dense<0.000000e+00> : vector<8x256xf32>
    %18 = tpu.matmul %15, %17, %cst_16 {dimension_numbers = #tpu.dot_dimension_numbers<[1], [0], [0], [1], [0, 0, 1, 1], [], []>} : vector<8x8xbf16>, vector<8x256xbf16>, vector<8x256xf32> -> vector<8x256xf32>
    %19 = arith.addf %14, %18 : vector<8x256xf32>
    %cst_17 = arith.constant 0.000000e+00 : f32
    %20 = vector.broadcast %cst_17 : f32 to vector<8x256xf32>
    %c0_18 = arith.constant 0 : index
    %c8 = arith.constant 8 : index
    %21 = vector.load %arg2[%c0_18, %c8] : memref<8x72xbf16, #tpu.memory_space<vmem>>, vector<8x8xbf16>
    %c0_19 = arith.constant 0 : index
    %c0_20 = arith.constant 0 : index
    %c112 = arith.constant 112 : index
    %22 = vector.load %arg1[%c0_19, %c0_20, %c112] : memref<1x8x512xbf16, #tpu.memory_space<vmem>>, vector<1x8x256xbf16>
    %23 = vector.shape_cast %22 : vector<1x8x256xbf16> to vector<8x256xbf16>
    %cst_21 = arith.constant dense<0.000000e+00> : vector<8x256xf32>
    %24 = tpu.matmul %21, %23, %cst_21 {dimension_numbers = #tpu.dot_dimension_numbers<[1], [0], [0], [1], [0, 0, 1, 1], [], []>} : vector<8x8xbf16>, vector<8x256xbf16>, vector<8x256xf32> -> vector<8x256xf32>
    %25 = arith.addf %20, %24 : vector<8x256xf32>
    %c0_22 = arith.constant 0 : index
    %c32 = arith.constant 32 : index
    %26 = vector.load %arg2[%c0_22, %c32] : memref<8x72xbf16, #tpu.memory_space<vmem>>, vector<8x8xbf16>
    %c0_23 = arith.constant 0 : index
    %c0_24 = arith.constant 0 : index
    %c128 = arith.constant 128 : index
    %27 = vector.load %arg1[%c0_23, %c0_24, %c128] : memref<1x8x512xbf16, #tpu.memory_space<vmem>>, vector<1x8x256xbf16>
    %28 = vector.shape_cast %27 : vector<1x8x256xbf16> to vector<8x256xbf16>
    %cst_25 = arith.constant dense<0.000000e+00> : vector<8x256xf32>
    %29 = tpu.matmul %26, %28, %cst_25 {dimension_numbers = #tpu.dot_dimension_numbers<[1], [0], [0], [1], [0, 0, 1, 1], [], []>} : vector<8x8xbf16>, vector<8x256xbf16>, vector<8x256xf32> -> vector<8x256xf32>
    %30 = arith.addf %25, %29 : vector<8x256xf32>
    %c0_26 = arith.constant 0 : index
    %c56 = arith.constant 56 : index
    %31 = vector.load %arg2[%c0_26, %c56] : memref<8x72xbf16, #tpu.memory_space<vmem>>, vector<8x8xbf16>
    %c0_27 = arith.constant 0 : index
    %c0_28 = arith.constant 0 : index
    %c144 = arith.constant 144 : index
    %32 = vector.load %arg1[%c0_27, %c0_28, %c144] : memref<1x8x512xbf16, #tpu.memory_space<vmem>>, vector<1x8x256xbf16>
    %33 = vector.shape_cast %32 : vector<1x8x256xbf16> to vector<8x256xbf16>
    %cst_29 = arith.constant dense<0.000000e+00> : vector<8x256xf32>
    %34 = tpu.matmul %31, %33, %cst_29 {dimension_numbers = #tpu.dot_dimension_numbers<[1], [0], [0], [1], [0, 0, 1, 1], [], []>} : vector<8x8xbf16>, vector<8x256xbf16>, vector<8x256xf32> -> vector<8x256xf32>
    %35 = arith.addf %30, %34 : vector<8x256xf32>
    %cst_30 = arith.constant 0.000000e+00 : f32
    %36 = vector.broadcast %cst_30 : f32 to vector<8x256xf32>
    %c0_31 = arith.constant 0 : index
    %c16 = arith.constant 16 : index
    %37 = vector.load %arg2[%c0_31, %c16] : memref<8x72xbf16, #tpu.memory_space<vmem>>, vector<8x8xbf16>
    %c0_32 = arith.constant 0 : index
    %c0_33 = arith.constant 0 : index
    %c113 = arith.constant 113 : index
    %38 = vector.load %arg1[%c0_32, %c0_33, %c113] : memref<1x8x512xbf16, #tpu.memory_space<vmem>>, vector<1x8x256xbf16>
    %39 = vector.shape_cast %38 : vector<1x8x256xbf16> to vector<8x256xbf16>
    %cst_34 = arith.constant dense<0.000000e+00> : vector<8x256xf32>
    %40 = tpu.matmul %37, %39, %cst_34 {dimension_numbers = #tpu.dot_dimension_numbers<[1], [0], [0], [1], [0, 0, 1, 1], [], []>} : vector<8x8xbf16>, vector<8x256xbf16>, vector<8x256xf32> -> vector<8x256xf32>
    %41 = arith.addf %36, %40 : vector<8x256xf32>
    %c0_35 = arith.constant 0 : index
    %c40 = arith.constant 40 : index
    %42 = vector.load %arg2[%c0_35, %c40] : memref<8x72xbf16, #tpu.memory_space<vmem>>, vector<8x8xbf16>
    %c0_36 = arith.constant 0 : index
    %c0_37 = arith.constant 0 : index
    %c129 = arith.constant 129 : index
    %43 = vector.load %arg1[%c0_36, %c0_37, %c129] : memref<1x8x512xbf16, #tpu.memory_space<vmem>>, vector<1x8x256xbf16>
    %44 = vector.shape_cast %43 : vector<1x8x256xbf16> to vector<8x256xbf16>
    %cst_38 = arith.constant dense<0.000000e+00> : vector<8x256xf32>
    %45 = tpu.matmul %42, %44, %cst_38 {dimension_numbers = #tpu.dot_dimension_numbers<[1], [0], [0], [1], [0, 0, 1, 1], [], []>} : vector<8x8xbf16>, vector<8x256xbf16>, vector<8x256xf32> -> vector<8x256xf32>
    %46 = arith.addf %41, %45 : vector<8x256xf32>
    %c0_39 = arith.constant 0 : index
    %c64 = arith.constant 64 : index
    %47 = vector.load %arg2[%c0_39, %c64] : memref<8x72xbf16, #tpu.memory_space<vmem>>, vector<8x8xbf16>
    %c0_40 = arith.constant 0 : index
    %c0_41 = arith.constant 0 : index
    %c145 = arith.constant 145 : index
    %48 = vector.load %arg1[%c0_40, %c0_41, %c145] : memref<1x8x512xbf16, #tpu.memory_space<vmem>>, vector<1x8x256xbf16>
    %49 = vector.shape_cast %48 : vector<1x8x256xbf16> to vector<8x256xbf16>
    %cst_42 = arith.constant dense<0.000000e+00> : vector<8x256xf32>
    %50 = tpu.matmul %47, %49, %cst_42 {dimension_numbers = #tpu.dot_dimension_numbers<[1], [0], [0], [1], [0, 0, 1, 1], [], []>} : vector<8x8xbf16>, vector<8x256xbf16>, vector<8x256xf32> -> vector<8x256xf32>
    %51 = arith.addf %46, %50 : vector<8x256xf32>
    %52 = vector.broadcast %1 : vector<1x256xf32> to vector<8x256xf32>
    %53 = arith.mulf %19, %52 : vector<8x256xf32>
    %54 = arith.addf %35, %53 : vector<8x256xf32>
    %55 = vector.broadcast %2 : vector<1x256xf32> to vector<8x256xf32>
    %56 = arith.mulf %51, %55 : vector<8x256xf32>
    %57 = arith.addf %54, %56 : vector<8x256xf32>
    %c0_43 = arith.constant 0 : index
    %c0_44 = arith.constant 0 : index
    %58 = vector.load %arg3[%c0_43, %c0_44] : memref<8x1xf32, #tpu.memory_space<vmem>>, vector<8x1xf32>
    %59 = vector.broadcast %58 : vector<8x1xf32> to vector<8x256xf32>
    %60 = arith.addf %57, %59 : vector<8x256xf32>
    %61 = arith.negf %60 : vector<8x256xf32>
    %62 = math.exp %61 : vector<8x256xf32>
    %cst_45 = arith.constant 1.000000e+00 : f32
    %63 = vector.broadcast %cst_45 : f32 to vector<8x256xf32>
    %64 = arith.addf %63, %62 : vector<8x256xf32>
    %65 = arith.divf %63, %64 : vector<8x256xf32>
    %66 = arith.mulf %60, %65 : vector<8x256xf32>
    %67 = vector.broadcast %0 : vector<1x256xf32> to vector<8x256xf32>
    %68 = arith.mulf %66, %67 : vector<8x256xf32>
    %c0_46 = arith.constant 0 : index
    %c0_47 = arith.constant 0 : index
    %69 = vector.load %arg8[%c0_46, %c0_47] : memref<8x512xbf16, #tpu.memory_space<vmem>>, vector<8x128xbf16>
    tpu.vector_store %arg8[%c0_46, %c0_47], %3 {strides = array<i32>} : memref<8x512xbf16, #tpu.memory_space<vmem>>, vector<8x128xbf16>,
    %c0_48 = arith.constant 0 : index
    %c384 = arith.constant 384 : index
    %70 = vector.load %arg8[%c0_48, %c384] : memref<8x512xbf16, #tpu.memory_space<vmem>>, vector<8x128xbf16>
    tpu.vector_store %arg8[%c0_48, %c384], %3 {strides = array<i32>} : memref<8x512xbf16, #tpu.memory_space<vmem>>, vector<8x128xbf16>,
    %71 = arith.truncf %68 : vector<8x256xf32> to vector<8x256xbf16>
    %c0_49 = arith.constant 0 : index
    %c128_50 = arith.constant 128 : index
    %72 = vector.load %arg8[%c0_49, %c128_50] : memref<8x512xbf16, #tpu.memory_space<vmem>>, vector<8x256xbf16>
    tpu.vector_store %arg8[%c0_49, %c128_50], %71 {strides = array<i32>} : memref<8x512xbf16, #tpu.memory_space<vmem>>, vector<8x256xbf16>,
    %cst_51 = arith.constant 0.000000e+00 : f32
    %73 = vector.broadcast %cst_51 : f32 to vector<8x256xf32>
    %c0_52 = arith.constant 0 : index
    %c0_53 = arith.constant 0 : index
    %74 = vector.load %arg4[%c0_52, %c0_53] : memref<8x72xbf16, #tpu.memory_space<vmem>>, vector<8x8xbf16>
    %c0_54 = arith.constant 0 : index
    %c111_55 = arith.constant 111 : index
    %75 = vector.load %arg8[%c0_54, %c111_55] : memref<8x512xbf16, #tpu.memory_space<vmem>>, vector<8x256xbf16>
    %cst_56 = arith.constant dense<0.000000e+00> : vector<8x256xf32>
    %76 = tpu.matmul %74, %75, %cst_56 {dimension_numbers = #tpu.dot_dimension_numbers<[1], [0], [0], [1], [0, 0, 1, 1], [], []>} : vector<8x8xbf16>, vector<8x256xbf16>, vector<8x256xf32> -> vector<8x256xf32>
    %77 = arith.addf %73, %76 : vector<8x256xf32>
    %c0_57 = arith.constant 0 : index
    %c24_58 = arith.constant 24 : index
    %78 = vector.load %arg4[%c0_57, %c24_58] : memref<8x72xbf16, #tpu.memory_space<vmem>>, vector<8x8xbf16>
    %c0_59 = arith.constant 0 : index
    %c127_60 = arith.constant 127 : index
    %79 = vector.load %arg8[%c0_59, %c127_60] : memref<8x512xbf16, #tpu.memory_space<vmem>>, vector<8x256xbf16>
    %cst_61 = arith.constant dense<0.000000e+00> : vector<8x256xf32>
    %80 = tpu.matmul %78, %79, %cst_61 {dimension_numbers = #tpu.dot_dimension_numbers<[1], [0], [0], [1], [0, 0, 1, 1], [], []>} : vector<8x8xbf16>, vector<8x256xbf16>, vector<8x256xf32> -> vector<8x256xf32>
    %81 = arith.addf %77, %80 : vector<8x256xf32>
    %c0_62 = arith.constant 0 : index
    %c48_63 = arith.constant 48 : index
    %82 = vector.load %arg4[%c0_62, %c48_63] : memref<8x72xbf16, #tpu.memory_space<vmem>>, vector<8x8xbf16>
    %c0_64 = arith.constant 0 : index
    %c143_65 = arith.constant 143 : index
    %83 = vector.load %arg8[%c0_64, %c143_65] : memref<8x512xbf16, #tpu.memory_space<vmem>>, vector<8x256xbf16>
    %cst_66 = arith.constant dense<0.000000e+00> : vector<8x256xf32>
    %84 = tpu.matmul %82, %83, %cst_66 {dimension_numbers = #tpu.dot_dimension_numbers<[1], [0], [0], [1], [0, 0, 1, 1], [], []>} : vector<8x8xbf16>, vector<8x256xbf16>, vector<8x256xf32> -> vector<8x256xf32>
    %85 = arith.addf %81, %84 : vector<8x256xf32>
    %cst_67 = arith.constant 0.000000e+00 : f32
    %86 = vector.broadcast %cst_67 : f32 to vector<8x256xf32>
    %c0_68 = arith.constant 0 : index
    %c8_69 = arith.constant 8 : index
    %87 = vector.load %arg4[%c0_68, %c8_69] : memref<8x72xbf16, #tpu.memory_space<vmem>>, vector<8x8xbf16>
    %c0_70 = arith.constant 0 : index
    %c112_71 = arith.constant 112 : index
    %88 = vector.load %arg8[%c0_70, %c112_71] : memref<8x512xbf16, #tpu.memory_space<vmem>>, vector<8x256xbf16>
    %cst_72 = arith.constant dense<0.000000e+00> : vector<8x256xf32>
    %89 = tpu.matmul %87, %88, %cst_72 {dimension_numbers = #tpu.dot_dimension_numbers<[1], [0], [0], [1], [0, 0, 1, 1], [], []>} : vector<8x8xbf16>, vector<8x256xbf16>, vector<8x256xf32> -> vector<8x256xf32>
    %90 = arith.addf %86, %89 : vector<8x256xf32>
    %c0_73 = arith.constant 0 : index
    %c32_74 = arith.constant 32 : index
    %91 = vector.load %arg4[%c0_73, %c32_74] : memref<8x72xbf16, #tpu.memory_space<vmem>>, vector<8x8xbf16>
    %c0_75 = arith.constant 0 : index
    %c128_76 = arith.constant 128 : index
    %92 = vector.load %arg8[%c0_75, %c128_76] : memref<8x512xbf16, #tpu.memory_space<vmem>>, vector<8x256xbf16>
    %cst_77 = arith.constant dense<0.000000e+00> : vector<8x256xf32>
    %93 = tpu.matmul %91, %92, %cst_77 {dimension_numbers = #tpu.dot_dimension_numbers<[1], [0], [0], [1], [0, 0, 1, 1], [], []>} : vector<8x8xbf16>, vector<8x256xbf16>, vector<8x256xf32> -> vector<8x256xf32>
    %94 = arith.addf %90, %93 : vector<8x256xf32>
    %c0_78 = arith.constant 0 : index
    %c56_79 = arith.constant 56 : index
    %95 = vector.load %arg4[%c0_78, %c56_79] : memref<8x72xbf16, #tpu.memory_space<vmem>>, vector<8x8xbf16>
    %c0_80 = arith.constant 0 : index
    %c144_81 = arith.constant 144 : index
    %96 = vector.load %arg8[%c0_80, %c144_81] : memref<8x512xbf16, #tpu.memory_space<vmem>>, vector<8x256xbf16>
    %cst_82 = arith.constant dense<0.000000e+00> : vector<8x256xf32>
    %97 = tpu.matmul %95, %96, %cst_82 {dimension_numbers = #tpu.dot_dimension_numbers<[1], [0], [0], [1], [0, 0, 1, 1], [], []>} : vector<8x8xbf16>, vector<8x256xbf16>, vector<8x256xf32> -> vector<8x256xf32>
    %98 = arith.addf %94, %97 : vector<8x256xf32>
    %cst_83 = arith.constant 0.000000e+00 : f32
    %99 = vector.broadcast %cst_83 : f32 to vector<8x256xf32>
    %c0_84 = arith.constant 0 : index
    %c16_85 = arith.constant 16 : index
    %100 = vector.load %arg4[%c0_84, %c16_85] : memref<8x72xbf16, #tpu.memory_space<vmem>>, vector<8x8xbf16>
    %c0_86 = arith.constant 0 : index
    %c113_87 = arith.constant 113 : index
    %101 = vector.load %arg8[%c0_86, %c113_87] : memref<8x512xbf16, #tpu.memory_space<vmem>>, vector<8x256xbf16>
    %cst_88 = arith.constant dense<0.000000e+00> : vector<8x256xf32>
    %102 = tpu.matmul %100, %101, %cst_88 {dimension_numbers = #tpu.dot_dimension_numbers<[1], [0], [0], [1], [0, 0, 1, 1], [], []>} : vector<8x8xbf16>, vector<8x256xbf16>, vector<8x256xf32> -> vector<8x256xf32>
    %103 = arith.addf %99, %102 : vector<8x256xf32>
    %c0_89 = arith.constant 0 : index
    %c40_90 = arith.constant 40 : index
    %104 = vector.load %arg4[%c0_89, %c40_90] : memref<8x72xbf16, #tpu.memory_space<vmem>>, vector<8x8xbf16>
    %c0_91 = arith.constant 0 : index
    %c129_92 = arith.constant 129 : index
    %105 = vector.load %arg8[%c0_91, %c129_92] : memref<8x512xbf16, #tpu.memory_space<vmem>>, vector<8x256xbf16>
    %cst_93 = arith.constant dense<0.000000e+00> : vector<8x256xf32>
    %106 = tpu.matmul %104, %105, %cst_93 {dimension_numbers = #tpu.dot_dimension_numbers<[1], [0], [0], [1], [0, 0, 1, 1], [], []>} : vector<8x8xbf16>, vector<8x256xbf16>, vector<8x256xf32> -> vector<8x256xf32>
    %107 = arith.addf %103, %106 : vector<8x256xf32>
    %c0_94 = arith.constant 0 : index
    %c64_95 = arith.constant 64 : index
    %108 = vector.load %arg4[%c0_94, %c64_95] : memref<8x72xbf16, #tpu.memory_space<vmem>>, vector<8x8xbf16>
    %c0_96 = arith.constant 0 : index
    %c145_97 = arith.constant 145 : index
    %109 = vector.load %arg8[%c0_96, %c145_97] : memref<8x512xbf16, #tpu.memory_space<vmem>>, vector<8x256xbf16>
    %cst_98 = arith.constant dense<0.000000e+00> : vector<8x256xf32>
    %110 = tpu.matmul %108, %109, %cst_98 {dimension_numbers = #tpu.dot_dimension_numbers<[1], [0], [0], [1], [0, 0, 1, 1], [], []>} : vector<8x8xbf16>, vector<8x256xbf16>, vector<8x256xf32> -> vector<8x256xf32>
    %111 = arith.addf %107, %110 : vector<8x256xf32>
    %112 = vector.broadcast %1 : vector<1x256xf32> to vector<8x256xf32>
    %113 = arith.mulf %85, %112 : vector<8x256xf32>
    %114 = arith.addf %98, %113 : vector<8x256xf32>
    %115 = vector.broadcast %2 : vector<1x256xf32> to vector<8x256xf32>
    %116 = arith.mulf %111, %115 : vector<8x256xf32>
    %117 = arith.addf %114, %116 : vector<8x256xf32>
    %c0_99 = arith.constant 0 : index
    %c0_100 = arith.constant 0 : index
    %118 = vector.load %arg5[%c0_99, %c0_100] : memref<8x1xf32, #tpu.memory_space<vmem>>, vector<8x1xf32>
    %119 = vector.broadcast %118 : vector<8x1xf32> to vector<8x256xf32>
    %120 = arith.addf %117, %119 : vector<8x256xf32>
    %121 = arith.negf %120 : vector<8x256xf32>
    %122 = math.exp %121 : vector<8x256xf32>
    %cst_101 = arith.constant 1.000000e+00 : f32
    %123 = vector.broadcast %cst_101 : f32 to vector<8x256xf32>
    %124 = arith.addf %123, %122 : vector<8x256xf32>
    %125 = arith.divf %123, %124 : vector<8x256xf32>
    %126 = arith.mulf %120, %125 : vector<8x256xf32>
    %127 = vector.broadcast %0 : vector<1x256xf32> to vector<8x256xf32>
    %128 = arith.mulf %126, %127 : vector<8x256xf32>
    %c0_102 = arith.constant 0 : index
    %c0_103 = arith.constant 0 : index
    %c0_104 = arith.constant 0 : index
    %129 = vector.load %arg7[%c0_102, %c0_103, %c0_104] : memref<1x8x512xbf16, #tpu.memory_space<vmem>>, vector<1x8x128xbf16>
    %130 = vector.shape_cast %129 : vector<1x8x128xbf16> to vector<8x128xbf16>
    %131 = vector.shape_cast %3 : vector<8x128xbf16> to vector<1x8x128xbf16>
    tpu.vector_store %arg7[%c0_102, %c0_103, %c0_104], %131 {strides = array<i32>} : memref<1x8x512xbf16, #tpu.memory_space<vmem>>, vector<1x8x128xbf16>,
    %c0_105 = arith.constant 0 : index
    %c0_106 = arith.constant 0 : index
    %c384_107 = arith.constant 384 : index
    %132 = vector.load %arg7[%c0_105, %c0_106, %c384_107] : memref<1x8x512xbf16, #tpu.memory_space<vmem>>, vector<1x8x128xbf16>
    %133 = vector.shape_cast %132 : vector<1x8x128xbf16> to vector<8x128xbf16>
    %134 = vector.shape_cast %3 : vector<8x128xbf16> to vector<1x8x128xbf16>
    tpu.vector_store %arg7[%c0_105, %c0_106, %c384_107], %134 {strides = array<i32>} : memref<1x8x512xbf16, #tpu.memory_space<vmem>>, vector<1x8x128xbf16>,
    %135 = arith.truncf %128 : vector<8x256xf32> to vector<8x256xbf16>
    %c0_108 = arith.constant 0 : index
    %c0_109 = arith.constant 0 : index
    %c128_110 = arith.constant 128 : index
    %136 = vector.load %arg7[%c0_108, %c0_109, %c128_110] : memref<1x8x512xbf16, #tpu.memory_space<vmem>>, vector<1x8x256xbf16>
    %137 = vector.shape_cast %136 : vector<1x8x256xbf16> to vector<8x256xbf16>
    %138 = vector.shape_cast %135 : vector<8x256xbf16> to vector<1x8x256xbf16>
    tpu.vector_store %arg7[%c0_108, %c0_109, %c128_110], %138 {strides = array<i32>} : memref<1x8x512xbf16, #tpu.memory_space<vmem>>, vector<1x8x256xbf16>,
    return
  }
  func.func @transform_0(%arg0: i32) -> (i32, i32, i32) {
    %c0_i32 = arith.constant 0 : i32
    %c0_i32_0 = arith.constant 0 : i32
    %c0_i32_1 = arith.constant 0 : i32
    return %arg0, %c0_i32, %c0_i32_0 : i32, i32, i32
  }
  func.func @transform_1(%arg0: i32) -> (i32, i32) {
    %c0_i32 = arith.constant 0 : i32
    %c0_i32_0 = arith.constant 0 : i32
    %c0_i32_1 = arith.constant 0 : i32
    return %c0_i32, %c0_i32_0 : i32, i32
  }
  func.func @transform_2(%arg0: i32) -> (i32, i32) {
    %c0_i32 = arith.constant 0 : i32
    %c0_i32_0 = arith.constant 0 : i32
    %c0_i32_1 = arith.constant 0 : i32
    return %c0_i32, %c0_i32_0 : i32, i32
  }
  func.func @transform_3(%arg0: i32) -> (i32, i32) {
    %c0_i32 = arith.constant 0 : i32
    %c0_i32_0 = arith.constant 0 : i32
    %c0_i32_1 = arith.constant 0 : i32
    return %c0_i32, %c0_i32_0 : i32, i32
  }
  func.func @transform_4(%arg0: i32) -> (i32, i32) {
    %c0_i32 = arith.constant 0 : i32
    %c0_i32_0 = arith.constant 0 : i32
    %c0_i32_1 = arith.constant 0 : i32
    return %c0_i32, %c0_i32_0 : i32, i32
  }
  func.func @transform_5(%arg0: i32) -> (i32, i32) {
    %c0_i32 = arith.constant 0 : i32
    %c0_i32_0 = arith.constant 0 : i32
    %c0_i32_1 = arith.constant 0 : i32
    return %c0_i32, %c0_i32_0 : i32, i32
  }
  func.func @transform_6(%arg0: i32) -> (i32, i32, i32) {
    %c0_i32 = arith.constant 0 : i32
    %c0_i32_0 = arith.constant 0 : i32
    %c0_i32_1 = arith.constant 0 : i32
    return %arg0, %c0_i32, %c0_i32_0 : i32, i32, i32
  }
}

module attributes {stable_mosaic.version = 11 : i64} {
  func.func @_entry1x1_kernel(%arg0: i32, %arg1: memref<1x4x256xf32, #tpu.memory_space<vmem>>, %arg2: memref<16x4xbf16, #tpu.memory_space<vmem>>, %arg3: memref<16x1xf32, #tpu.memory_space<vmem>>, %arg4: memref<1x8x512xbf16, #tpu.memory_space<vmem>>, %arg5: memref<1x8x512xbf16, #tpu.memory_space<vmem>>) attributes {dimension_semantics = [#tpu.dimension_semantics<parallel>], iteration_bounds = array<i64: 2>, scalar_prefetch = 0 : i64, scratch_operands = 0 : i64, tpu.core_type = #tpu.core_type<tc>, window_params = [{transform_indices = @transform_0, window_bounds = array<i64: 1, 4, 256>}, {pipeline_mode = #tpu.pipeline_mode<synchronous>, transform_indices = @transform_1, window_bounds = array<i64: 16, 4>}, {pipeline_mode = #tpu.pipeline_mode<synchronous>, transform_indices = @transform_2, window_bounds = array<i64: 16, 1>}, {transform_indices = @transform_3, window_bounds = array<i64: 1, 8, 512>}, {transform_indices = @transform_4, window_bounds = array<i64: 1, 8, 512>}]} {
    %c0 = arith.constant 0 : index
    %c0_0 = arith.constant 0 : index
    %c0_1 = arith.constant 0 : index
    %0 = vector.load %arg1[%c0, %c0_0, %c0_1] : memref<1x4x256xf32, #tpu.memory_space<vmem>>, vector<1x4x256xf32>
    %1 = vector.shape_cast %0 : vector<1x4x256xf32> to vector<4x256xf32>
    %2 = arith.truncf %1 : vector<4x256xf32> to vector<4x256xbf16>
    %c0_2 = arith.constant 0 : index
    %c0_3 = arith.constant 0 : index
    %3 = vector.load %arg2[%c0_2, %c0_3] : memref<16x4xbf16, #tpu.memory_space<vmem>>, vector<16x4xbf16>
    %cst = arith.constant dense<0.000000e+00> : vector<16x256xf32>
    %4 = tpu.matmul %3, %2, %cst {dimension_numbers = #tpu.dot_dimension_numbers<[1], [0], [0], [1], [0, 0, 1, 1], [], []>} : vector<16x4xbf16>, vector<4x256xbf16>, vector<16x256xf32> -> vector<16x256xf32>
    %c0_4 = arith.constant 0 : index
    %c0_5 = arith.constant 0 : index
    %5 = vector.load %arg3[%c0_4, %c0_5] : memref<16x1xf32, #tpu.memory_space<vmem>>, vector<16x1xf32>
    %6 = vector.broadcast %5 : vector<16x1xf32> to vector<16x256xf32>
    %7 = arith.addf %4, %6 : vector<16x256xf32>
    %8 = arith.negf %7 : vector<16x256xf32>
    %9 = math.exp %8 : vector<16x256xf32>
    %cst_6 = arith.constant 1.000000e+00 : f32
    %10 = vector.broadcast %cst_6 : f32 to vector<16x256xf32>
    %11 = arith.addf %10, %9 : vector<16x256xf32>
    %12 = arith.divf %10, %11 : vector<16x256xf32>
    %13 = arith.mulf %7, %12 : vector<16x256xf32>
    %14 = arith.truncf %13 : vector<16x256xf32> to vector<16x256xbf16>
    %cst_7 = arith.constant 0.000000e+00 : bf16
    %15 = vector.broadcast %cst_7 : bf16 to vector<8x128xbf16>
    %cst_8 = arith.constant 0.000000e+00 : bf16
    %16 = vector.broadcast %cst_8 : bf16 to vector<8x128xbf16>
    %17 = vector.extract_strided_slice %14 {offsets = [0, 0], sizes = [8, 256], strides = [1, 1]} : vector<16x256xbf16> to vector<8x256xbf16>
    %18 = vector.extract_strided_slice %14 {offsets = [8, 0], sizes = [8, 256], strides = [1, 1]} : vector<16x256xbf16> to vector<8x256xbf16>
    %c0_9 = arith.constant 0 : index
    %c0_10 = arith.constant 0 : index
    %c0_11 = arith.constant 0 : index
    %19 = vector.load %arg4[%c0_9, %c0_10, %c0_11] : memref<1x8x512xbf16, #tpu.memory_space<vmem>>, vector<1x8x128xbf16>
    %20 = vector.shape_cast %19 : vector<1x8x128xbf16> to vector<8x128xbf16>
    %21 = vector.shape_cast %15 : vector<8x128xbf16> to vector<1x8x128xbf16>
    tpu.vector_store %arg4[%c0_9, %c0_10, %c0_11], %21 {strides = array<i32>} : memref<1x8x512xbf16, #tpu.memory_space<vmem>>, vector<1x8x128xbf16>,
    %c0_12 = arith.constant 0 : index
    %c0_13 = arith.constant 0 : index
    %c128 = arith.constant 128 : index
    %22 = vector.load %arg4[%c0_12, %c0_13, %c128] : memref<1x8x512xbf16, #tpu.memory_space<vmem>>, vector<1x8x256xbf16>
    %23 = vector.shape_cast %22 : vector<1x8x256xbf16> to vector<8x256xbf16>
    %24 = vector.shape_cast %17 : vector<8x256xbf16> to vector<1x8x256xbf16>
    tpu.vector_store %arg4[%c0_12, %c0_13, %c128], %24 {strides = array<i32>} : memref<1x8x512xbf16, #tpu.memory_space<vmem>>, vector<1x8x256xbf16>,
    %c0_14 = arith.constant 0 : index
    %c0_15 = arith.constant 0 : index
    %c384 = arith.constant 384 : index
    %25 = vector.load %arg4[%c0_14, %c0_15, %c384] : memref<1x8x512xbf16, #tpu.memory_space<vmem>>, vector<1x8x128xbf16>
    %26 = vector.shape_cast %25 : vector<1x8x128xbf16> to vector<8x128xbf16>
    %27 = vector.shape_cast %16 : vector<8x128xbf16> to vector<1x8x128xbf16>
    tpu.vector_store %arg4[%c0_14, %c0_15, %c384], %27 {strides = array<i32>} : memref<1x8x512xbf16, #tpu.memory_space<vmem>>, vector<1x8x128xbf16>,
    %c0_16 = arith.constant 0 : index
    %c0_17 = arith.constant 0 : index
    %c0_18 = arith.constant 0 : index
    %28 = vector.load %arg5[%c0_16, %c0_17, %c0_18] : memref<1x8x512xbf16, #tpu.memory_space<vmem>>, vector<1x8x128xbf16>
    %29 = vector.shape_cast %28 : vector<1x8x128xbf16> to vector<8x128xbf16>
    %30 = vector.shape_cast %15 : vector<8x128xbf16> to vector<1x8x128xbf16>
    tpu.vector_store %arg5[%c0_16, %c0_17, %c0_18], %30 {strides = array<i32>} : memref<1x8x512xbf16, #tpu.memory_space<vmem>>, vector<1x8x128xbf16>,
    %c0_19 = arith.constant 0 : index
    %c0_20 = arith.constant 0 : index
    %c128_21 = arith.constant 128 : index
    %31 = vector.load %arg5[%c0_19, %c0_20, %c128_21] : memref<1x8x512xbf16, #tpu.memory_space<vmem>>, vector<1x8x256xbf16>
    %32 = vector.shape_cast %31 : vector<1x8x256xbf16> to vector<8x256xbf16>
    %33 = vector.shape_cast %18 : vector<8x256xbf16> to vector<1x8x256xbf16>
    tpu.vector_store %arg5[%c0_19, %c0_20, %c128_21], %33 {strides = array<i32>} : memref<1x8x512xbf16, #tpu.memory_space<vmem>>, vector<1x8x256xbf16>,
    %c0_22 = arith.constant 0 : index
    %c0_23 = arith.constant 0 : index
    %c384_24 = arith.constant 384 : index
    %34 = vector.load %arg5[%c0_22, %c0_23, %c384_24] : memref<1x8x512xbf16, #tpu.memory_space<vmem>>, vector<1x8x128xbf16>
    %35 = vector.shape_cast %34 : vector<1x8x128xbf16> to vector<8x128xbf16>
    %36 = vector.shape_cast %16 : vector<8x128xbf16> to vector<1x8x128xbf16>
    tpu.vector_store %arg5[%c0_22, %c0_23, %c384_24], %36 {strides = array<i32>} : memref<1x8x512xbf16, #tpu.memory_space<vmem>>, vector<1x8x128xbf16>,
    return
  }
  func.func @transform_0(%arg0: i32) -> (i32, i32, i32) {
    %c0_i32 = arith.constant 0 : i32
    %c0_i32_0 = arith.constant 0 : i32
    %c0_i32_1 = arith.constant 0 : i32
    return %arg0, %c0_i32, %c0_i32_0 : i32, i32, i32
  }
  func.func @transform_1(%arg0: i32) -> (i32, i32) {
    %c0_i32 = arith.constant 0 : i32
    %c0_i32_0 = arith.constant 0 : i32
    %c0_i32_1 = arith.constant 0 : i32
    return %c0_i32, %c0_i32_0 : i32, i32
  }
  func.func @transform_2(%arg0: i32) -> (i32, i32) {
    %c0_i32 = arith.constant 0 : i32
    %c0_i32_0 = arith.constant 0 : i32
    %c0_i32_1 = arith.constant 0 : i32
    return %c0_i32, %c0_i32_0 : i32, i32
  }
  func.func @transform_3(%arg0: i32) -> (i32, i32, i32) {
    %c0_i32 = arith.constant 0 : i32
    %c0_i32_0 = arith.constant 0 : i32
    %c0_i32_1 = arith.constant 0 : i32
    return %arg0, %c0_i32, %c0_i32_0 : i32, i32, i32
  }
  func.func @transform_4(%arg0: i32) -> (i32, i32, i32) {
    %c0_i32 = arith.constant 0 : i32
    %c0_i32_0 = arith.constant 0 : i32
    %c0_i32_1 = arith.constant 0 : i32
    return %arg0, %c0_i32, %c0_i32_0 : i32, i32, i32
  }
}

module attributes {stable_mosaic.version = 11 : i64} {
  func.func @_concat1x1_kernel(%arg0: i32, %arg1: memref<1x8x512xbf16, #tpu.memory_space<vmem>>, %arg2: memref<1x8x512xbf16, #tpu.memory_space<vmem>>, %arg3: memref<1x8x512xbf16, #tpu.memory_space<vmem>>, %arg4: memref<8x24xbf16, #tpu.memory_space<vmem>>, %arg5: memref<8x1xf32, #tpu.memory_space<vmem>>, %arg6: memref<1x8x256xf32, #tpu.memory_space<vmem>>) attributes {dimension_semantics = [#tpu.dimension_semantics<parallel>], iteration_bounds = array<i64: 2>, scalar_prefetch = 0 : i64, scratch_operands = 0 : i64, tpu.core_type = #tpu.core_type<tc>, window_params = [{transform_indices = @transform_0, window_bounds = array<i64: 1, 8, 512>}, {transform_indices = @transform_1, window_bounds = array<i64: 1, 8, 512>}, {transform_indices = @transform_2, window_bounds = array<i64: 1, 8, 512>}, {pipeline_mode = #tpu.pipeline_mode<synchronous>, transform_indices = @transform_3, window_bounds = array<i64: 8, 24>}, {pipeline_mode = #tpu.pipeline_mode<synchronous>, transform_indices = @transform_4, window_bounds = array<i64: 8, 1>}, {transform_indices = @transform_5, window_bounds = array<i64: 1, 8, 256>}]} {
    %cst = arith.constant 0.000000e+00 : f32
    %0 = vector.broadcast %cst : f32 to vector<8x256xf32>
    %c0 = arith.constant 0 : index
    %c0_0 = arith.constant 0 : index
    %1 = vector.load %arg4[%c0, %c0_0] : memref<8x24xbf16, #tpu.memory_space<vmem>>, vector<8x8xbf16>
    %c0_1 = arith.constant 0 : index
    %c0_2 = arith.constant 0 : index
    %c128 = arith.constant 128 : index
    %2 = vector.load %arg1[%c0_1, %c0_2, %c128] : memref<1x8x512xbf16, #tpu.memory_space<vmem>>, vector<1x8x256xbf16>
    %3 = vector.shape_cast %2 : vector<1x8x256xbf16> to vector<8x256xbf16>
    %cst_3 = arith.constant dense<0.000000e+00> : vector<8x256xf32>
    %4 = tpu.matmul %1, %3, %cst_3 {dimension_numbers = #tpu.dot_dimension_numbers<[1], [0], [0], [1], [0, 0, 1, 1], [], []>} : vector<8x8xbf16>, vector<8x256xbf16>, vector<8x256xf32> -> vector<8x256xf32>
    %5 = arith.addf %0, %4 : vector<8x256xf32>
    %c0_4 = arith.constant 0 : index
    %c8 = arith.constant 8 : index
    %6 = vector.load %arg4[%c0_4, %c8] : memref<8x24xbf16, #tpu.memory_space<vmem>>, vector<8x8xbf16>
    %c0_5 = arith.constant 0 : index
    %c0_6 = arith.constant 0 : index
    %c128_7 = arith.constant 128 : index
    %7 = vector.load %arg2[%c0_5, %c0_6, %c128_7] : memref<1x8x512xbf16, #tpu.memory_space<vmem>>, vector<1x8x256xbf16>
    %8 = vector.shape_cast %7 : vector<1x8x256xbf16> to vector<8x256xbf16>
    %cst_8 = arith.constant dense<0.000000e+00> : vector<8x256xf32>
    %9 = tpu.matmul %6, %8, %cst_8 {dimension_numbers = #tpu.dot_dimension_numbers<[1], [0], [0], [1], [0, 0, 1, 1], [], []>} : vector<8x8xbf16>, vector<8x256xbf16>, vector<8x256xf32> -> vector<8x256xf32>
    %10 = arith.addf %5, %9 : vector<8x256xf32>
    %c0_9 = arith.constant 0 : index
    %c16 = arith.constant 16 : index
    %11 = vector.load %arg4[%c0_9, %c16] : memref<8x24xbf16, #tpu.memory_space<vmem>>, vector<8x8xbf16>
    %c0_10 = arith.constant 0 : index
    %c0_11 = arith.constant 0 : index
    %c128_12 = arith.constant 128 : index
    %12 = vector.load %arg3[%c0_10, %c0_11, %c128_12] : memref<1x8x512xbf16, #tpu.memory_space<vmem>>, vector<1x8x256xbf16>
    %13 = vector.shape_cast %12 : vector<1x8x256xbf16> to vector<8x256xbf16>
    %cst_13 = arith.constant dense<0.000000e+00> : vector<8x256xf32>
    %14 = tpu.matmul %11, %13, %cst_13 {dimension_numbers = #tpu.dot_dimension_numbers<[1], [0], [0], [1], [0, 0, 1, 1], [], []>} : vector<8x8xbf16>, vector<8x256xbf16>, vector<8x256xf32> -> vector<8x256xf32>
    %15 = arith.addf %10, %14 : vector<8x256xf32>
    %c0_14 = arith.constant 0 : index
    %c0_15 = arith.constant 0 : index
    %16 = vector.load %arg5[%c0_14, %c0_15] : memref<8x1xf32, #tpu.memory_space<vmem>>, vector<8x1xf32>
    %17 = vector.broadcast %16 : vector<8x1xf32> to vector<8x256xf32>
    %18 = arith.addf %15, %17 : vector<8x256xf32>
    %19 = arith.negf %18 : vector<8x256xf32>
    %20 = math.exp %19 : vector<8x256xf32>
    %cst_16 = arith.constant 1.000000e+00 : f32
    %21 = vector.broadcast %cst_16 : f32 to vector<8x256xf32>
    %22 = arith.addf %21, %20 : vector<8x256xf32>
    %23 = arith.divf %21, %22 : vector<8x256xf32>
    %24 = arith.mulf %18, %23 : vector<8x256xf32>
    %c0_17 = arith.constant 0 : index
    %c0_18 = arith.constant 0 : index
    %c0_19 = arith.constant 0 : index
    %25 = vector.load %arg6[%c0_17, %c0_18, %c0_19] : memref<1x8x256xf32, #tpu.memory_space<vmem>>, vector<1x8x256xf32>
    %26 = vector.shape_cast %25 : vector<1x8x256xf32> to vector<8x256xf32>
    %27 = vector.shape_cast %24 : vector<8x256xf32> to vector<1x8x256xf32>
    tpu.vector_store %arg6[%c0_17, %c0_18, %c0_19], %27 {strides = array<i32>} : memref<1x8x256xf32, #tpu.memory_space<vmem>>, vector<1x8x256xf32>,
    return
  }
  func.func @transform_0(%arg0: i32) -> (i32, i32, i32) {
    %c0_i32 = arith.constant 0 : i32
    %c0_i32_0 = arith.constant 0 : i32
    %c0_i32_1 = arith.constant 0 : i32
    return %arg0, %c0_i32, %c0_i32_0 : i32, i32, i32
  }
  func.func @transform_1(%arg0: i32) -> (i32, i32, i32) {
    %c0_i32 = arith.constant 0 : i32
    %c0_i32_0 = arith.constant 0 : i32
    %c0_i32_1 = arith.constant 0 : i32
    return %arg0, %c0_i32, %c0_i32_0 : i32, i32, i32
  }
  func.func @transform_2(%arg0: i32) -> (i32, i32, i32) {
    %c0_i32 = arith.constant 0 : i32
    %c0_i32_0 = arith.constant 0 : i32
    %c0_i32_1 = arith.constant 0 : i32
    return %arg0, %c0_i32, %c0_i32_0 : i32, i32, i32
  }
  func.func @transform_3(%arg0: i32) -> (i32, i32) {
    %c0_i32 = arith.constant 0 : i32
    %c0_i32_0 = arith.constant 0 : i32
    %c0_i32_1 = arith.constant 0 : i32
    return %c0_i32, %c0_i32_0 : i32, i32
  }
  func.func @transform_4(%arg0: i32) -> (i32, i32) {
    %c0_i32 = arith.constant 0 : i32
    %c0_i32_0 = arith.constant 0 : i32
    %c0_i32_1 = arith.constant 0 : i32
    return %c0_i32, %c0_i32_0 : i32, i32
  }
  func.func @transform_5(%arg0: i32) -> (i32, i32, i32) {
    %c0_i32 = arith.constant 0 : i32
    %c0_i32_0 = arith.constant 0 : i32
    %c0_i32_1 = arith.constant 0 : i32
    return %arg0, %c0_i32, %c0_i32_0 : i32, i32, i32
  }
}

</mosaic_0001>

<bundles_post_ra>
// kernel: c2f_forward.3
= control target key start
LH: loop header
LB: loop body
LE: loop exit
PB: predicated region body
PF: predicated region fallthrough
CT: control target
= control target key end

     0   :  { %s514_s15 = smov 0   ;;  %s553_s0 = inlined_call_operand.vmem [shape: f32[2,4,256], index: 0, kind: input, shape index: {}]   ;;  %s554_s1 = inlined_call_operand.vmem [shape: bf16[16,4], index: 1, kind: input, shape index: {}]   ;;  %s555_s2 = inlined_call_operand.vmem [shape: f32[16,1], index: 2, kind: input, shape index: {}]   ;;  %s556_s3 = inlined_call_operand.vmem [shape: bf16[2,8,512], index: 3, kind: output, shape index: {0}]   ;;  %s557_s4 = inlined_call_operand.vmem [shape: bf16[2,8,512], index: 4, kind: output, shape index: {1}]  }
   0x1 LB: > { %s425_s16 = sadd.s32 4294967295, %s486_s15   ;;  %p429_p0 = scmp.ge.s32.totalorder %s486_s15, 1  ;;  %s486_s15 = sphi %s514_s15, %s15_s15  }
   0x2   : > { %p165_p1 = scmp.lt.s32.totalorder %s486_s15, 3 }
   0x4   : > { %p166_p2 = pnand %p429_p0, %p165_p1 }
   0x5   : > { %p196_p3 = scmp.lt.s32.totalorder (!%p166_p2), %s425_s16, 1  ;;  %v488_v0 = vmov (!%p166_p2), 0   ;;  %v220_v1 = vld [vmem:[%s555_s2] sm:$0xff] (!%p166_p2)  ;;  %v221_v2 = vld [vmem:[%s555_s2 + $0x8] sm:$0xff] (!%p166_p2)  ;;  %vm241_vm0 = vcmask (!%p166_p2), 1041408   ;;  %vm237_vm1 = vcmask (!%p166_p2), 31744  }
   0x6   : > { %169 = sbr.rel (%p166_p2) target bundleno = 273 (0x111), region = 32  ;;  %280 = vmatprep.mubr.bf16.mxu0 (!%p166_p2), %v488_v0  ;;  %461 = vset.pattern.permute.xlu0 (!%p166_p2), %v488_v0  ;;  %v463_v8 = vld [vmem:[%s554_s1] sm:$0xff] (!%p166_p2)  }
   0x7   : > { %224 = vperm.xlu0 (!%p166_p2), %461, %v220_v1  }
   0xb   : > { %229 = vperm.xlu0 (!%p166_p2), %461, %v221_v2  }
   0xd   : > { %s559_s16 = smov (!%p196_p3, %s425_s16), 1 }
   0xe   : > { %s447_s21 = sshll.u32 %s559_s16, 3  ;;  %s448_s22 = sshll.u32 %s559_s16, 4 }
   0xf   : > { %s200_s25 = scalar_lea.vmem %s553_s0, %s447_s21  ;;  %s534_s28 = scalar_lea.vmem %s556_s3, %s448_s22 }
  0x10   : > { %s539_s5 = scalar_lea.vmem %s557_s4, %s448_s22  ;;  %v212_v3 = vld [vmem:[%s200_s25] sm:$0xff]  ;;  %321 = vst [vmem:[%s534_s28] sm:$0xf] %v488_v0  ;;  %329 = vst [vmem:[%s534_s28 + $0xc] sm:$0xf] %v488_v0 }
  0x11   : > { %v214_v4 = vcombine.high %v212_v3, %v212_v3  ;;  %v216_v5 = vpack.c.bf16 %v212_v3, %v212_v3  ;;  %330 = vst [vmem:[%s539_s5] sm:$0xf] %v488_v0  ;;  %336 = vst [vmem:[%s539_s5 + $0xc] sm:$0xf] %v488_v0 }
  0x13   : > { %v217_v6 = vpack.c.bf16 %v214_v4, %v214_v4  ;;  %v243_v7 = vsel %vm241_vm0, %v216_v5, 0 }
  0x15   : > { %437 = vmatprep.subr.msk.bf16.mxu0 %vm241_vm0, %v217_v6 }
  0x16   : > { %249 = vmatpush1.bf16.msra.mxu0 %v243_v7 }
  0x19   : > { %438 = vmatmul.mubr.msk.bf16.vlgmr.msra.gmra.mrb[0].mxu0 %vm237_vm1, %v463_v8 }
  0x86   : > { %v225_v9 = vpop.permute.xlu0 %224 }
  0x8a   : > { %v230_v13 = vpop.permute.xlu0 %229 }
  0xec   : > { %v282_v10 = vpop.f32.mrb[0].mxu0 }
  0xed   : > { %v283_v11 = vadd.f32 %v282_v10, %v225_v9  ;;  %v284_v12 = vpop.f32.mrb[1].mxu0 }
  0xee   : > { %v285_v14 = vadd.f32 %v284_v12, %v225_v9  ;;  %v286_v15 = vpop.f32.mrb[2].mxu0 }
  0xef   : > { %v439_v16 = vmul.f32 -1.442695, %v283_v11  ;;  %v287_v17 = vadd.f32 %v286_v15, %v230_v13  ;;  %v288_v18 = vpop.f32.mrb[3].mxu0 }
  0xf0   : > { %v440_v19 = vmul.f32 -1.442695, %v285_v14  ;;  %v289_v20 = vadd.f32 %v288_v18, %v230_v13 }
  0xf1   : > { %464 = vpow2.f32 %v439_v16  ;;  %v441_v21 = vmul.f32 -1.442695, %v287_v17 }
  0xf2   : > { %466 = vpow2.f32 %v440_v19  ;;  %v442_v22 = vmul.f32 -1.442695, %v289_v20 }
  0xf3   : > { %468 = vpow2.f32 %v441_v21 }
  0xf4   : > { %470 = vpow2.f32 %v442_v22 }
  0xfb   : > { %v465_v23 = vpop.eup %464 }
  0xfc   : > { %v467_v24 = vpop.eup %466  ;;  %v303_v25 = vadd.f32 1.0, %v465_v23 }
  0xfd   : > { %v469_v26 = vpop.eup %468  ;;  %v304_v27 = vadd.f32 1.0, %v467_v24 }
  0xfe   : > { %v471_v28 = vpop.eup %470  ;;  %472 = vrcp.f32 %v303_v25  ;;  %v305_v29 = vadd.f32 1.0, %v469_v26 }
  0xff   : > { %474 = vrcp.f32 %v304_v27  ;;  %v306_v30 = vadd.f32 1.0, %v471_v28 }
 0x100   : > { %476 = vrcp.f32 %v305_v29 }
 0x101   : > { %478 = vrcp.f32 %v306_v30 }
 0x108   : > { %v473_v31 = vpop.eup %472 }
 0x109   : > { %v475_v32 = vpop.eup %474  ;;  %v315_v33 = vmul.f32 %v473_v31, %v283_v11 }
 0x10a   : > { %v477_v34 = vpop.eup %476  ;;  %v316_v35 = vmul.f32 %v475_v32, %v285_v14 }
 0x10b   : > { %v479_v36 = vpop.eup %478  ;;  %v317_v37 = vmul.f32 %v477_v34, %v287_v17 }
 0x10c   : > { %v450_v38 = vpack.c.bf16 %v316_v35, %v315_v33  ;;  %v318_v39 = vmul.f32 %v479_v36, %v289_v20 }
 0x10e   : > { %328 = vst [vmem:[%s534_s28 + $0x4] sm:$0xff] %v450_v38  ;;  %v451_v40 = vpack.c.bf16 %v318_v39, %v317_v37 }
 0x110   : > { %335 = vst [vmem:[%s539_s5 + $0x4] sm:$0xff] %v451_v40 }
 0x111 PF: > { %s15_s15 = sadd.s32 1, %s486_s15  }
 0x112   : > { %p12_p4 = scmp.ge.s32.totalorder %s15_s15, 4  }
 0x114   :  { %14 = sbr.rel (!%p12_p4) target bundleno = 1 (0x1), region = 74 }

// kernel: c2f_forward.5
= control target key start
LH: loop header
LB: loop body
LE: loop exit
PB: predicated region body
PF: predicated region fallthrough
CT: control target
= control target key end

     0   :  { %s652_s18 = smov 0   ;;  %s693_s0 = inlined_call_operand.vmem [shape: bf16[2,8,512], index: 0, kind: input, shape index: {}]   ;;  %s694_s1 = inlined_call_operand.vmem [shape: bf16[2,8,512], index: 1, kind: input, shape index: {}]   ;;  %s695_s2 = inlined_call_operand.vmem [shape: bf16[2,8,512], index: 2, kind: input, shape index: {}]   ;;  %s696_s3 = inlined_call_operand.vmem [shape: bf16[8,24], index: 3, kind: input, shape index: {}]   ;;  %s697_s4 = inlined_call_operand.vmem [shape: f32[8,1], index: 4, kind: input, shape index: {}]   ;;  %s698_s5 = inlined_call_operand.vmem [shape: f32[2,8,256], index: 5, kind: output, shape index: {}]  }
   0x1 LB: > { %s549_s19 = sadd.s32 4294967295, %s617_s18   ;;  %p553_p0 = scmp.ge.s32.totalorder %s617_s18, 1  ;;  %s617_s18 = sphi %s652_s18, %s15_s18  }
   0x2   : > { %p207_p1 = scmp.lt.s32.totalorder %s617_s18, 3 }
   0x4   : > { %p208_p2 = pnand %p553_p0, %p207_p1 }
   0x5   : > { %v266_v0 = vld [vmem:[%s696_s3] sm:$0xf] (!%p208_p2)  ;;  %p245_p3 = scmp.lt.s32.totalorder (!%p208_p2), %s549_s19, 1  ;;  %v619_v2 = vmov (!%p208_p2), 0   ;;  %s620_s24 = smov (!%p208_p2), 120   ;;  %vm283_vm0 = vcmask (!%p208_p2), 1043456  }
   0x6   : > { %211 = sbr.rel (%p208_p2) target bundleno = 377 (0x179), region = 40  ;;  %v562_v1 = vcombine.low (!%p208_p2), %v266_v0, %v266_v0  ;;  %322 = vmatprep.mubr.bf16.mxu0 (!%p208_p2), %v619_v2  ;;  %377 = vmatprep.mubr.bf16.mxu1 (!%p208_p2), %v619_v2  ;;  %v446_v3 = vld [vmem:[%s697_s4] sm:$0xff] (!%p208_p2)  ;;  %s621_s7 = smov (!%p208_p2), 112   ;;  %vm279_vm1 = vcmask (!%p208_p2), 64512  }
   0x7   : > { %594 = vset.pattern.permute.xlu1 (!%p208_p2), %v619_v2  ;;  %595 = vset.pattern.permute.xlu0 (!%p208_p2), %v619_v2 }
   0x8   : > { %272 = vrot.lane.b32.xlu0 (!%p208_p2), %v562_v1, %s620_s24  ;;  %449 = vperm.xlu1 (!%p208_p2), %594, %v446_v3  }
   0xc   : > { %387 = vrot.lane.b32.xlu0 (!%p208_p2), %v562_v1, %s621_s7 }
   0xd   : > { %s700_s19 = smov (!%p245_p3, %s549_s19), 1 }
   0xe   : > { %s666_s25 = sshll.u32 %s700_s19, 4 }
   0xf   : > { %s254_s28 = scalar_lea.vmem %s694_s1, %s666_s25  ;;  %s249_s6 = scalar_lea.vmem %s693_s0, %s666_s25 }
  0x10   : > { %v268_v4 = vld [vmem:[%s254_s28 + $0x4] sm:$0xff]  ;;  %s259_s10 = scalar_lea.vmem %s695_s2, %s666_s25  ;;  %s264_s13 = scalar_lea.vmem %s698_s5, %s666_s25 }
  0x11   : > { %v267_v5 = vld [vmem:[%s249_s6 + $0x4] sm:$0xff]  ;;  %v564_v6 = vcombine.high %v268_v4, %v268_v4  ;;  %v563_v7 = vcombine.low %v268_v4, %v268_v4 }
  0x12   : > { %v568_v8 = vcombine.high %v267_v5, %v267_v5  ;;  %v567_v9 = vcombine.low %v267_v5, %v267_v5  ;;  %v386_v10 = vld [vmem:[%s259_s10 + $0x4] sm:$0xff] }
  0x13   : > { %v572_v11 = vcombine.high %v386_v10, %v386_v10  ;;  %v571_v12 = vcombine.low %v386_v10, %v386_v10  ;;  %565 = vmatprep.subr.msk.bf16.mxu0 %vm283_vm0, %v564_v6  ;;  %v285_v13 = vsel %vm283_vm0, %v563_v7, 0 }
  0x14   : > { %569 = vmatprep.subr.msk.bf16.mxu1 %vm283_vm0, %v568_v8  ;;  %v340_v14 = vsel %vm283_vm0, %v567_v9, 0  ;;  %291 = vmatpush1.bf16.msra.mxu0 %v285_v13 }
  0x15   : > { %346 = vmatpush1.bf16.msra.mxu1 %v340_v14  ;;  %v398_v15 = vsel %vm283_vm0, %v571_v12, 0  ;;  %573 = vmatprep.subr.msk.bf16.mxu0 %vm283_vm0, %v572_v11 }
  0x18   : > { %570 = vmatmul.mubr.msk.bf16.vlgmr.msra.gmra.mrb[0].mxu1 %vm279_vm1, %v266_v0 }
  0x7a   : > { %v273_v16 = vpop.permute.xlu0 %272 }
  0x7b   : > { %566 = vmatmul.mubr.msk.bf16.vlgmr.msra.gmra.mrb[0].mxu0 %vm279_vm1, %v273_v16 }
  0x7c   : > { %404 = vmatpush1.bf16.msra.mxu0 %v398_v15  ;;  %435 = vmatprep.mubr.bf16.mxu0 %v619_v2 }
  0x7e   : > { %v388_v17 = vpop.permute.xlu0 %387 }
  0x83   : > { %574 = vmatmul.mubr.msk.bf16.vlgmr.msra.gmra.mrb[4].mxu0 %vm279_vm1, %v388_v17 }
  0x87   : > { %v450_v29 = vpop.permute.xlu1 %449 }
  0xeb   : > { %v379_v18 = vpop.f32.mrb[0].mxu1 }
  0xec   : > { %v381_v19 = vpop.f32.mrb[1].mxu1 }
  0xed   : > { %v383_v20 = vpop.f32.mrb[2].mxu1 }
  0xee   : > { %v384_v21 = vpop.f32.mrb[3].mxu1 }
 0x14e   : > { %v324_v22 = vpop.f32.mrb[0].mxu0 }
 0x14f   : > { %v380_v23 = vadd.f32 %v379_v18, %v324_v22  ;;  %v326_v24 = vpop.f32.mrb[1].mxu0 }
 0x150   : > { %v382_v25 = vadd.f32 %v381_v19, %v326_v24  ;;  %v328_v26 = vpop.f32.mrb[2].mxu0 }
 0x151   : > { %v329_v27 = vpop.f32.mrb[3].mxu0 }
 0x156   : > { %v437_v28 = vpop.f32.mrb[4].mxu0 }
 0x157   : > { %v444_v30 = vadd.f32 %v437_v28, %v380_v23  ;;  %v439_v31 = vpop.f32.mrb[5].mxu0 }
 0x158   : > { %v445_v32 = vadd.f32 %v439_v31, %v382_v25  ;;  %v441_v33 = vpop.f32.mrb[6].mxu0 }
 0x159   : > { %v452_v34 = vadd.f32 %v450_v29, %v444_v30  ;;  %v442_v35 = vpop.f32.mrb[7].mxu0 }
 0x15a   : > { %v453_v36 = vadd.f32 %v450_v29, %v445_v32 }
 0x15b   : > { %v575_v37 = vmul.f32 -1.442695, %v452_v34 }
 0x15c   : > { %v576_v38 = vmul.f32 -1.442695, %v453_v36 }
 0x15d   : > { %603 = vpow2.f32 %v575_v37 }
 0x15e   : > { %605 = vpow2.f32 %v576_v38 }
 0x167   : > { %v604_v39 = vpop.eup %603 }
 0x168   : > { %v606_v40 = vpop.eup %605  ;;  %v460_v41 = vadd.f32 1.0, %v604_v39 }
 0x169   : > { %v461_v42 = vadd.f32 1.0, %v606_v40 }
 0x16a   : > { %607 = vrcp.f32 %v460_v41 }
 0x16b   : > { %609 = vrcp.f32 %v461_v42 }
 0x174   : > { %v608_v43 = vpop.eup %607 }
 0x175   : > { %v610_v44 = vpop.eup %609  ;;  %v466_v45 = vmul.f32 %v608_v43, %v452_v34 }
 0x176   : > { %v467_v46 = vmul.f32 %v610_v44, %v453_v36 }
 0x177   : > { %468 = vst [vmem:[%s264_s13] sm:$0xff] %v466_v45 }
 0x178   : > { %469 = vst [vmem:[%s264_s13 + $0x8] sm:$0xff] %v467_v46 }
 0x179 PF: > { %s15_s18 = sadd.s32 1, %s617_s18  }
 0x17a   : > { %p12_p4 = scmp.ge.s32.totalorder %s15_s18, 4  }
 0x17c   :  { %14 = sbr.rel (!%p12_p4) target bundleno = 1 (0x1), region = 76 }

// kernel: c2f_forward.4
= control target key start
LH: loop header
LB: loop body
LE: loop exit
PB: predicated region body
PF: predicated region fallthrough
CT: control target
= control target key end

     0   :  { %s1797_s21 = smov 0   ;;  %s2068_s0 = inlined_call_operand.vmem [shape: bf16[2,8,512], index: 0, kind: input, shape index: {}]   ;;  %s2069_s1 = inlined_call_operand.vmem [shape: bf16[8,72], index: 1, kind: input, shape index: {}]   ;;  %s2070_s2 = inlined_call_operand.vmem [shape: f32[8,1], index: 2, kind: input, shape index: {}]   ;;  %s2071_s3 = inlined_call_operand.vmem [shape: bf16[8,72], index: 3, kind: input, shape index: {}]   ;;  %s2072_s4 = inlined_call_operand.vmem [shape: f32[8,1], index: 4, kind: input, shape index: {}]   ;;  %s2073_s5 = inlined_call_operand.vmem [shape: f32[8,256], index: 5, kind: input, shape index: {}]   ;;  %s2074_s6 = inlined_call_operand.vmem [shape: bf16[2,8,512], index: 6, kind: output, shape index: {}]  }
   0x1 LB: > { %s1574_s22 = sadd.s32 4294967295, %s1744_s21   ;;  %p1578_p0 = scmp.ge.s32.totalorder %s1744_s21, 1  ;;  %s1744_s21 = sphi %s1797_s21, %s16_s21  }
   0x2   : > { %p212_p1 = scmp.lt.s32.totalorder %s1744_s21, 3 }
   0x4   : > { %p213_p2 = pnand %p1578_p0, %p212_p1 }
   0x5   : > { %p242_p3 = scmp.lt.s32.totalorder (!%p213_p2), %s1574_s22, 1  ;;  %v1746_v0 = vmov (!%p213_p2), 0   ;;  %v1820_v1 = vld [vmem:[%s2069_s1] sm:$0xf] (!%p213_p2)  ;;  %s1747_s29 = smov (!%p213_p2), 1   ;;  %vm280_vm0 = vcmask (!%p213_p2), 7168  }
   0x6   : > { %216 = sbr.rel (%p213_p2) target bundleno = 908 (0x38c), region = 44  ;;  %326 = vmatprep.mubr.bf16.mxu0 (!%p213_p2), %v1746_v0  ;;  %899 = vst [vmem:[#allocation2] sm:$0xf] (!%p213_p2), %v1746_v0  ;;  %900 = vst [vmem:[#allocation2 + $0xc] sm:$0xf] (!%p213_p2), %v1746_v0  ;;  %577 = vmatprep.mubr.bf16.mxu1 (!%p213_p2), %v1746_v0  ;;  %v1585_v5 = vcombine.low (!%p213_p2), %v1820_v1, %v1820_v1  ;;  %s1748_s30 = smov (!%p213_p2), 104  }
   0x7   : > { %1707 = vset.pattern.permute.xlu0 (!%p213_p2), %v1746_v0  ;;  %s1749_s7 = smov (!%p213_p2), 17   ;;  %s1750_s8 = smov (!%p213_p2), 113   ;;  %v864_v11 = vld [vmem:[%s2070_s2] sm:$0xff] (!%p213_p2)  ;;  %vm287_vm1 = vcmask (!%p213_p2), 1043456   ;;  %vm341_vm2 = vcmask (!%p213_p2), 138240   ;;  %vm283_vm3 = vcmask (!%p213_p2), 64512  }
   0x8   : > { %s1751_s9 = smov (!%p213_p2), 96   ;;  %s1752_s10 = smov (!%p213_p2), 80   ;;  %vm412_vm4 = vcmask (!%p213_p2), 924672   ;;  %vm657_vm5 = vcmask (!%p213_p2), 1039360   ;;  %vm718_vm6 = vcmask (!%p213_p2), 121856   ;;  %vm533_vm7 = vcmask (!%p213_p2), 130048  }
   0x9   : > { %s1753_s11 = smov (!%p213_p2), 127   ;;  %s1754_s12 = smov (!%p213_p2), 88   ;;  %vm594_vm8 = vcmask (!%p213_p2), 916480   ;;  %vm779_vm9 = vcmask (!%p213_p2), 908288  }
   0xa   : > { %s1755_s13 = smov (!%p213_p2), 15   ;;  %s1756_s14 = smov (!%p213_p2), 16  }
   0xb   : > { %s1757_s15 = smov (!%p213_p2), 120   ;;  %s1758_s16 = smov (!%p213_p2), 112  }
   0xc   : > { %s1759_s17 = smov (!%p213_p2), 111   ;;  %s1760_s18 = smov (!%p213_p2), 64  }
   0xd   : > { %s2076_s22 = smov (!%p242_p3, %s1574_s22), 1  ;;  %s1761_s19 = smov 72  }
   0xe   : > { %s1647_s23 = sshll.u32 %s2076_s22, 4 }
   0xf   : > { %s246_s26 = scalar_lea.vmem %s2068_s0, %s1647_s23 }
  0x10   : > { %v1708_v2 = vld [vmem:[%s246_s26 + $0x8] ss:$0 sps:$4 sm:$0xff]   ;;  %v259_v3 = vld [vmem:[%s246_s26] sm:$0xff]  ;;  %v1713_v9 = vld [vmem:[%s246_s26 + $0xc] ss:$0 sps:$4 sm:$0xff]  }
  0x11   : > { %v1586_v4 = vcombine.low %v259_v3, %v259_v3  ;;  %278 = vrot.lane.b32.xlu1 %v1708_v2, %s1747_s29  ;;  %v1587_v6 = vcombine.high %v259_v3, %v259_v3  ;;  %v394_v7 = vld [vmem:[%s246_s26 + $0x4] sm:$0xff] }
  0x12   : > { %v1830_v8 = vcombine.low %v394_v7, %v394_v7  ;;  %v1836_v10 = vcombine.high %v394_v7, %v394_v7 }
  0x13   : > { %274 = vrot.lane.b32.xlu0 %v1586_v4, %s1747_s29 }
  0x14   : > { %v479_v39 = vsel %vm287_vm1, %v1830_v8, 0 }
  0x15   : > { %264 = vrot.lane.b32.xlu1 %v1585_v5, %s1748_s30 }
  0x17   : > { %276 = vrot.lane.b32.xlu0 %v1587_v6, %s1747_s29 }
  0x19   : > { %337 = vrot.lane.b32.xlu1 %v1587_v6, %s1749_s7 }
  0x1b   : > { %335 = vrot.lane.b32.xlu0 %v1586_v4, %s1749_s7 }
  0x1d   : > { %406 = vrot.lane.b32.xlu1 %v1830_v8, %s1750_s8 }
  0x1f   : > { %339 = vrot.lane.b32.xlu0 %v1708_v2, %s1749_s7 }
  0x21   : > { %410 = vrot.lane.b32.xlu1 %v1713_v9, %s1750_s8 }
  0x23   : > { %408 = vrot.lane.b32.xlu0 %v1836_v10, %s1750_s8 }
  0x25   : > { %468 = vrot.lane.b32.xlu1 %v1585_v5, %s1751_s9 }
  0x27   : > { %396 = vrot.lane.b32.xlu0 %v1585_v5, %s1752_s10 }
  0x29   : > { %653 = vrot.lane.b32.xlu1 %v1836_v10, %s1753_s11 }
  0x2b   : > { %651 = vrot.lane.b32.xlu0 %v1830_v8, %s1753_s11 }
  0x2d   : > { %649 = vrot.lane.b32.xlu1 %v1585_v5, %s1754_s12 }
  0x2f   : > { %655 = vrot.lane.b32.xlu0 %v1713_v9, %s1753_s11 }
  0x31   : > { %714 = vrot.lane.b32.xlu1 %v1587_v6, %s1755_s13 }
  0x33   : > { %712 = vrot.lane.b32.xlu0 %v1586_v4, %s1755_s13 }
  0x35   : > { %527 = vrot.lane.b32.xlu1 %v1586_v4, %s1756_s14 }
  0x37   : > { %716 = vrot.lane.b32.xlu0 %v1708_v2, %s1755_s13 }
  0x39   : > { %531 = vrot.lane.b32.xlu1 %v1708_v2, %s1756_s14 }
  0x3b   : > { %529 = vrot.lane.b32.xlu0 %v1587_v6, %s1756_s14 }
  0x3d   : > { %525 = vrot.lane.b32.xlu1 %v1585_v5, %s1757_s15 }
  0x3f   : > { %710 = vrot.lane.b32.xlu0 %v1585_v5, %s1758_s16 }
  0x41   : > { %590 = vrot.lane.b32.xlu1 %v1836_v10, %s1758_s16 }
  0x43   : > { %588 = vrot.lane.b32.xlu0 %v1830_v8, %s1758_s16 }
  0x45   : > { %773 = vrot.lane.b32.xlu1 %v1830_v8, %s1759_s17 }
  0x47   : > { %592 = vrot.lane.b32.xlu0 %v1713_v9, %s1758_s16 }
  0x49   : > { %777 = vrot.lane.b32.xlu1 %v1713_v9, %s1759_s17 }
  0x4b   : > { %775 = vrot.lane.b32.xlu0 %v1836_v10, %s1759_s17 }
  0x4d   : > { %771 = vrot.lane.b32.xlu1 %v1585_v5, %s1760_s18 }
  0x4f   : > { %586 = vrot.lane.b32.xlu0 %v1585_v5, %s1761_s19 }
  0x53   : > { %867 = vperm.xlu0 %1707, %v864_v11  }
  0x83   : > { %v279_v12 = vpop.permute.xlu1 %278 }
  0x85   : > { %v275_v13 = vpop.permute.xlu0 %274 }
  0x87   : > { %v265_v14 = vpop.permute.xlu1 %264 }
  0x89   : > { %v277_v15 = vpop.permute.xlu0 %276 }
  0x8a   : > { %v282_v16 = vsel %vm280_vm0, %v277_v15, %v279_v12  ;;  %v281_v17 = vsel %vm280_vm0, %v275_v13, %v277_v15 }
  0x8b   : > { %1589 = vmatprep.subr.msk.bf16.mxu0 %vm287_vm1, %v282_v16  ;;  %v289_v18 = vsel %vm287_vm1, %v281_v17, 0  ;;  %v338_v19 = vpop.permute.xlu1 %337 }
  0x8c   : > { %295 = vmatpush1.bf16.msra.mxu0 %v289_v18 }
  0x8d   : > { %v336_v20 = vpop.permute.xlu0 %335 }
  0x8e   : > { %v342_v21 = vsel %vm341_vm2, %v336_v20, %v338_v19 }
  0x8f   : > { %1590 = vmatmul.mubr.msk.bf16.vlgmr.msra.gmra.mrb[0].mxu0 %vm283_vm3, %v265_v14  ;;  %v407_v22 = vpop.permute.xlu1 %406  ;;  %v348_v23 = vsel %vm287_vm1, %v342_v21, 0  ;;  %v835_v14 = vlaneseq }
  0x90   : > { %385 = vmatprep.mubr.bf16.mxu0 %v1746_v0 }
  0x91   : > { %v340_v24 = vpop.permute.xlu0 %339  ;;  %v836_v21 = vshrl.u32 %v835_v14, 7  ;;  %v1484_v14 = vld [vmem:[%s2072_s4] sm:$0xff] }
  0x92   : > { %v343_v25 = vsel %vm341_vm2, %v338_v19, %v340_v24 }
  0x93   : > { %1591 = vmatprep.subr.msk.bf16.mxu0 %vm287_vm1, %v343_v25  ;;  %v411_v26 = vpop.permute.xlu1 %410  ;;  %v841_v24 = vsub.s32 1, %v836_v21 }
  0x94   : > { %354 = vmatpush1.bf16.msra.mxu0 %v348_v23  ;;  %v1583_v23 = vld [vmem:[%s2073_s5 + $0x1] ss:$8 sm:$0x3] }
  0x95   : > { %v409_v27 = vpop.permute.xlu0 %408 }
  0x96   : > { %v413_v28 = vsel %vm412_vm4, %v407_v22, %v409_v27  ;;  %v414_v29 = vsel %vm412_vm4, %v409_v27, %v411_v26  ;;  %v837_v22 = vsub.s32 0, %v836_v21  ;;  %v1932_v26 = vrot.slane %v1583_v23, %v841_v24 }
  0x97   : > { %1596 = vmatprep.subr.msk.bf16.mxu0 %vm287_vm1, %v414_v29  ;;  %v469_v30 = vpop.permute.xlu1 %468  ;;  %v419_v31 = vsel %vm287_vm1, %v413_v28, 0 }
  0x98   : > { %v1930_v25 = vrot.slane %v1583_v23, %v837_v22 }
  0x99   : > { %v397_v32 = vpop.permute.xlu0 %396 }
  0x9b   : > { %1592 = vmatmul.mubr.msk.bf16.vlgmr.msra.gmra.mrb[0].mxu0 %vm283_vm3, %v1820_v1  ;;  %v654_v33 = vpop.permute.xlu1 %653 }
  0x9c   : > { %425 = vmatpush1.bf16.msra.mxu0 %v419_v31  ;;  %456 = vmatprep.mubr.bf16.mxu0 %v1746_v0 }
  0x9d   : > { %v652_v34 = vpop.permute.xlu0 %651  ;;  %1600 = vmatprep.subr.msk.bf16.mxu0 %vm287_vm1, %v1836_v10 }
  0x9e   : > { %v658_v43 = vsel %vm657_vm5, %v652_v34, %v654_v33 }
  0x9f   : > { %v650_v35 = vpop.permute.xlu1 %649  ;;  %v664_v49 = vsel %vm287_vm1, %v658_v43, 0 }
  0xa1   : > { %v656_v36 = vpop.permute.xlu0 %655 }
  0xa2   : > { %v659_v40 = vsel %vm657_vm5, %v654_v33, %v656_v36 }
  0xa3   : > { %v715_v37 = vpop.permute.xlu1 %714 }
  0xa5   : > { %v713_v38 = vpop.permute.xlu0 %712 }
  0xa6   : > { %v719_v53 = vsel %vm718_vm6, %v713_v38, %v715_v37 }
  0xa7   : > { %1597 = vmatmul.mubr.msk.bf16.vlgmr.msra.gmra.mrb[0].mxu0 %vm283_vm3, %v397_v32  ;;  %v528_v41 = vpop.permute.xlu1 %527  ;;  %v725_v57 = vsel %vm287_vm1, %v719_v53, 0 }
  0xa8   : > { %485 = vmatpush1.bf16.msra.mxu0 %v479_v39  ;;  %516 = vmatprep.mubr.bf16.mxu0 %v1746_v0 }
  0xa9   : > { %1606 = vmatprep.subr.msk.bf16.mxu0 %vm287_vm1, %v659_v40  ;;  %v717_v42 = vpop.permute.xlu0 %716 }
  0xaa   : > { %v720_v46 = vsel %vm718_vm6, %v715_v37, %v717_v42  ;;  %v1584_v37 = vld [vmem:[%s2073_s5 + $0x2] ss:$8 sm:$0x3] }
  0xab   : > { %v532_v44 = vpop.permute.xlu1 %531  ;;  %v1939_v38 = vrot.slane %v1584_v37, %v837_v22  ;;  %v1941_v39 = vrot.slane %v1584_v37, %v841_v24 }
  0xad   : > { %v530_v45 = vpop.permute.xlu0 %529 }
  0xae   : > { %v535_v47 = vsel %vm533_vm7, %v530_v45, %v532_v44  ;;  %v534_v48 = vsel %vm533_vm7, %v528_v41, %v530_v45 }
  0xaf   : > { %1601 = vmatmul.mubr.msk.bf16.vlgmr.msra.gmra.mrb[4].mxu0 %vm283_vm3, %v469_v30  ;;  %1602 = vmatprep.subr.msk.bf16.mxu1 %vm287_vm1, %v535_v47  ;;  %v540_v50 = vsel %vm287_vm1, %v534_v48, 0  ;;  %v526_v51 = vpop.permute.xlu1 %525 }
  0xb0   : > { %670 = vmatpush1.bf16.msra.mxu0 %v664_v49  ;;  %546 = vmatpush1.bf16.msra.mxu1 %v540_v50 }
  0xb1   : > { %1608 = vmatprep.subr.msk.bf16.mxu0 %vm287_vm1, %v720_v46  ;;  %v711_v52 = vpop.permute.xlu0 %710  ;;  %701 = vmatprep.mubr.bf16.mxu0 %v1746_v0 }
  0xb3   : > { %1603 = vmatmul.mubr.msk.bf16.vlgmr.msra.gmra.mrb[0].mxu1 %vm283_vm3, %v526_v51  ;;  %v591_v54 = vpop.permute.xlu1 %590 }
  0xb4   : > { %638 = vmatprep.mubr.bf16.mxu1 %v1746_v0 }
  0xb5   : > { %v589_v55 = vpop.permute.xlu0 %588 }
  0xb6   : > { %v595_v56 = vsel %vm594_vm8, %v589_v55, %v591_v54 }
  0xb7   : > { %1607 = vmatmul.mubr.msk.bf16.vlgmr.msra.gmra.mrb[8].mxu0 %vm283_vm3, %v650_v35  ;;  %v774_v58 = vpop.permute.xlu1 %773  ;;  %v601_v59 = vsel %vm287_vm1, %v595_v56, 0 }
  0xb8   : > { %731 = vmatpush1.bf16.msra.mxu0 %v725_v57  ;;  %762 = vmatprep.mubr.bf16.mxu0 %v1746_v0  ;;  %v253_v57 = vld [vmem:[%s2073_s5] ss:$8 sm:$0x3] }
  0xb9   : > { %v593_v60 = vpop.permute.xlu0 %592 }
  0xba   : > { %v596_v61 = vsel %vm594_vm8, %v591_v54, %v593_v60  ;;  %v1950_v60 = vrot.slane %v253_v57, %v841_v24 }
  0xbb   : > { %1604 = vmatprep.subr.msk.bf16.mxu1 %vm287_vm1, %v596_v61  ;;  %v778_v62 = vpop.permute.xlu1 %777 }
  0xbc   : > { %607 = vmatpush1.bf16.msra.mxu1 %v601_v59 }
  0xbd   : > { %v776_v63 = vpop.permute.xlu0 %775 }
  0xbe   : > { %v780_v1 = vsel %vm779_vm9, %v774_v58, %v776_v63  ;;  %v781_v2 = vsel %vm779_vm9, %v776_v63, %v778_v62  ;;  %v1948_v58 = vrot.slane %v253_v57, %v837_v22 }
  0xbf   : > { %1610 = vmatprep.subr.msk.bf16.mxu0 %vm287_vm1, %v781_v2  ;;  %v786_v3 = vsel %vm287_vm1, %v780_v1, 0  ;;  %v772_v5 = vpop.permute.xlu1 %771 }
  0xc1   : > { %v587_v4 = vpop.permute.xlu0 %586 }
  0xc2   : > { %1605 = vmatmul.mubr.msk.bf16.vlgmr.msra.gmra.mrb[4].mxu1 %vm283_vm3, %v587_v4 }
  0xc3   : > { %1609 = vmatmul.mubr.msk.bf16.vlgmr.msra.gmra.mrb[8].mxu0 %vm283_vm3, %v711_v52  ;;  %975 = vmatprep.mubr.bf16.mxu1 %v1746_v0 }
  0xc4   : > { %792 = vmatpush1.bf16.msra.mxu0 %v786_v3  ;;  %823 = vmatprep.mubr.bf16.mxu0 %v1746_v0 }
  0xcf   : > { %1611 = vmatmul.mubr.msk.bf16.vlgmr.msra.gmra.mrb[8].mxu0 %vm283_vm3, %v772_v5 }
  0xd0   : > { %1163 = vmatprep.mubr.bf16.mxu0 %v1746_v0 }
  0xd2   : > { %v868_v45 = vpop.permute.xlu0 %867 }
 0x17a   : > { %v458_v6 = vpop.f32.mrb[0].mxu0 }
 0x17b   : > { %v460_v7 = vpop.f32.mrb[1].mxu0  ;;  %v845_v28 = vmul.f32 %v1930_v25, %v458_v6 }
 0x17c   : > { %v462_v8 = vpop.f32.mrb[2].mxu0  ;;  %v846_v31 = vmul.f32 %v1932_v26, %v460_v7 }
 0x17d   : > { %v463_v9 = vpop.f32.mrb[3].mxu0 }
 0x182   : > { %v518_v10 = vpop.f32.mrb[4].mxu0 }
 0x183   : > { %v520_v11 = vpop.f32.mrb[5].mxu0 }
 0x184   : > { %v522_v12 = vpop.f32.mrb[6].mxu0 }
 0x185   : > { %v523_v13 = vpop.f32.mrb[7].mxu0 }
 0x186   : > { %v579_v15 = vpop.f32.mrb[0].mxu1  ;;  %v1719_v13 = vld [vmem:[#allocation2 + $0xc] ss:$0 sps:$4 sm:$0xff]  }
 0x187   : > { %v580_v16 = vadd.f32 %v579_v15, %v518_v10  ;;  %v581_v17 = vpop.f32.mrb[1].mxu1  ;;  %v1961_v10 = vld [vmem:[%s2071_s3] sm:$0xf] }
 0x188   : > { %v582_v18 = vadd.f32 %v581_v17, %v520_v11  ;;  %v583_v19 = vpop.f32.mrb[2].mxu1  ;;  %v1615_v12 = vcombine.low %v1961_v10, %v1961_v10 }
 0x189   : > { %v584_v20 = vpop.f32.mrb[3].mxu1 }
 0x195   : > { %v640_v27 = vpop.f32.mrb[4].mxu1 }
 0x196   : > { %v647_v29 = vadd.f32 %v640_v27, %v580_v16  ;;  %v642_v30 = vpop.f32.mrb[5].mxu1 }
 0x197   : > { %v648_v32 = vadd.f32 %v642_v30, %v582_v18  ;;  %v644_v33 = vpop.f32.mrb[6].mxu1 }
 0x198   : > { %v847_v34 = vadd.f32 %v845_v28, %v647_v29  ;;  %v645_v35 = vpop.f32.mrb[7].mxu1 }
 0x199   : > { %v848_v36 = vadd.f32 %v846_v31, %v648_v32 }
 0x1a2   : > { %v825_v40 = vpop.f32.mrb[8].mxu0 }
 0x1a3   : > { %v860_v41 = vmul.f32 %v1939_v38, %v825_v40  ;;  %v827_v42 = vpop.f32.mrb[9].mxu0 }
 0x1a4   : > { %v861_v43 = vmul.f32 %v1941_v39, %v827_v42  ;;  %v829_v44 = vpop.f32.mrb[10].mxu0 }
 0x1a5   : > { %v862_v46 = vadd.f32 %v860_v41, %v847_v34  ;;  %v830_v47 = vpop.f32.mrb[11].mxu0 }
 0x1a6   : > { %v863_v48 = vadd.f32 %v861_v43, %v848_v36 }
 0x1a7   : > { %v870_v49 = vadd.f32 %v868_v45, %v862_v46 }
 0x1a8   : > { %v871_v50 = vadd.f32 %v868_v45, %v863_v48 }
 0x1a9   : > { %v1612_v51 = vmul.f32 -1.442695, %v870_v49 }
 0x1aa   : > { %v1613_v52 = vmul.f32 -1.442695, %v871_v50 }
 0x1ab   : > { %1720 = vpow2.f32 %v1612_v51 }
 0x1ac   : > { %1722 = vpow2.f32 %v1613_v52 }
 0x1b5   : > { %v1721_v53 = vpop.eup %1720 }
 0x1b6   : > { %v1723_v54 = vpop.eup %1722  ;;  %v878_v55 = vadd.f32 1.0, %v1721_v53 }
 0x1b7   : > { %v879_v56 = vadd.f32 1.0, %v1723_v54 }
 0x1b8   : > { %1724 = vrcp.f32 %v878_v55 }
 0x1b9   : > { %1726 = vrcp.f32 %v879_v56 }
 0x1c2   : > { %v1725_v59 = vpop.eup %1724 }
 0x1c3   : > { %v1727_v61 = vpop.eup %1726  ;;  %v884_v62 = vmul.f32 %v1725_v59, %v870_v49 }
 0x1c4   : > { %v885_v63 = vmul.f32 %v1727_v61, %v871_v50 }
 0x1c5   : > { %v897_v1 = vmul.f32 %v1948_v58, %v884_v62 }
 0x1c6   : > { %v898_v2 = vmul.f32 %v1950_v60, %v885_v63 }
 0x1c7   : > { %v1737_v5 = vpack.c.bf16 %v897_v1, %v897_v1 }
 0x1c8   : > { %v1649_v3 = vpack.c.bf16 %v898_v2, %v897_v1  ;;  %v1736_v4 = vpack.c.bf16 %v898_v2, %v898_v2 }
 0x1c9   : > { %v1126_v6 = vsel %vm287_vm1, %v1737_v5, 0 }
 0x1ca   : > { %909 = vst [vmem:[#allocation2 + $0x4] sm:$0xff] %v1649_v3  ;;  %1630 = vmatprep.subr.msk.bf16.mxu0 %vm287_vm1, %v1736_v4 }
 0x1cb   : > { %1132 = vmatpush1.bf16.msra.mxu0 %v1126_v6 }
 0x1d1   : > { %v1715_v7 = vld [vmem:[#allocation2 + $0x8] ss:$0 sps:$4 sm:$0xff]   ;;  %v911_v8 = vld [vmem:[#allocation2] sm:$0xff] }
 0x1d2   : > { %v1616_v9 = vcombine.low %v911_v8, %v911_v8  ;;  %930 = vrot.lane.b32.xlu0 %v1715_v7, %s1747_s29  ;;  %v1617_v11 = vcombine.high %v911_v8, %v911_v8 }
 0x1d4   : > { %926 = vrot.lane.b32.xlu1 %v1616_v9, %s1747_s29 }
 0x1d6   : > { %984 = vrot.lane.b32.xlu0 %v1616_v9, %s1749_s7 }
 0x1d8   : > { %928 = vrot.lane.b32.xlu1 %v1617_v11, %s1747_s29 }
 0x1da   : > { %988 = vrot.lane.b32.xlu0 %v1715_v7, %s1749_s7 }
 0x1dc   : > { %916 = vrot.lane.b32.xlu1 %v1615_v12, %s1748_s30 }
 0x1de   : > { %1056 = vrot.lane.b32.xlu0 %v1736_v4, %s1750_s8 }
 0x1e0   : > { %986 = vrot.lane.b32.xlu1 %v1617_v11, %s1749_s7 }
 0x1e2   : > { %1044 = vrot.lane.b32.xlu0 %v1615_v12, %s1752_s10 }
 0x1e4   : > { %1058 = vrot.lane.b32.xlu1 %v1719_v13, %s1750_s8 }
 0x1e6   : > { %1176 = vrot.lane.b32.xlu0 %v1617_v11, %s1756_s14 }
 0x1e8   : > { %1054 = vrot.lane.b32.xlu1 %v1737_v5, %s1750_s8 }
 0x1ea   : > { %1172 = vrot.lane.b32.xlu0 %v1615_v12, %s1757_s15 }
 0x1ec   : > { %1174 = vrot.lane.b32.xlu1 %v1616_v9, %s1756_s14 }
 0x1ee   : > { %1298 = vrot.lane.b32.xlu0 %v1736_v4, %s1753_s11 }
 0x1f0   : > { %1178 = vrot.lane.b32.xlu1 %v1715_v7, %s1756_s14 }
 0x1f2   : > { %1294 = vrot.lane.b32.xlu0 %v1615_v12, %s1754_s12 }
 0x1f4   : > { %1300 = vrot.lane.b32.xlu1 %v1719_v13, %s1753_s11 }
 0x1f6   : > { %1354 = vrot.lane.b32.xlu0 %v1615_v12, %s1758_s16 }
 0x1f8   : > { %1296 = vrot.lane.b32.xlu1 %v1737_v5, %s1753_s11 }
 0x1fa   : > { %1358 = vrot.lane.b32.xlu0 %v1617_v11, %s1755_s13 }
 0x1fc   : > { %1115 = vrot.lane.b32.xlu1 %v1615_v12, %s1751_s9  ;;  %s2052_s9 = scalar_lea.vmem %s2074_s6, %s1647_s23 }
 0x1fd   : > { %1508 = vst [vmem:[%s2052_s9] sm:$0xf] %v1746_v0  ;;  %1509 = vst [vmem:[%s2052_s9 + $0xc] sm:$0xf] %v1746_v0 }
 0x1fe   : > { %1238 = vrot.lane.b32.xlu0 %v1719_v13, %s1758_s16 }
 0x200   : > { %1356 = vrot.lane.b32.xlu1 %v1616_v9, %s1755_s13 }
 0x202   : > { %1234 = vrot.lane.b32.xlu0 %v1737_v5, %s1758_s16 }
 0x204   : > { %1360 = vrot.lane.b32.xlu1 %v1715_v7, %s1755_s13 }
 0x206   : > { %1418 = vrot.lane.b32.xlu0 %v1736_v4, %s1759_s17 }
 0x208   : > { %1236 = vrot.lane.b32.xlu1 %v1736_v4, %s1758_s16 }
 0x20a   : > { %1232 = vrot.lane.b32.xlu0 %v1615_v12, %s1761_s19 }
 0x20c   : > { %1416 = vrot.lane.b32.xlu1 %v1737_v5, %s1759_s17 }
 0x20e   : > { %1487 = vperm.xlu0 %1707, %v1484_v14  }
 0x210   : > { %1420 = vrot.lane.b32.xlu1 %v1719_v13, %s1759_s17 }
 0x214   : > { %1414 = vrot.lane.b32.xlu1 %v1615_v12, %s1760_s18 }
 0x244   : > { %v931_v15 = vpop.permute.xlu0 %930 }
 0x246   : > { %v927_v16 = vpop.permute.xlu1 %926 }
 0x248   : > { %v985_v17 = vpop.permute.xlu0 %984 }
 0x24a   : > { %v929_v18 = vpop.permute.xlu1 %928 }
 0x24b   : > { %v932_v19 = vsel %vm280_vm0, %v927_v16, %v929_v18  ;;  %v933_v20 = vsel %vm280_vm0, %v929_v18, %v931_v15 }
 0x24c   : > { %v938_v21 = vsel %vm287_vm1, %v932_v19, 0  ;;  %1619 = vmatprep.subr.msk.bf16.mxu1 %vm287_vm1, %v933_v20  ;;  %v989_v22 = vpop.permute.xlu0 %988 }
 0x24d   : > { %944 = vmatpush1.bf16.msra.mxu1 %v938_v21 }
 0x24e   : > { %v917_v23 = vpop.permute.xlu1 %916 }
 0x250   : > { %1620 = vmatmul.mubr.msk.bf16.vlgmr.msra.gmra.mrb[8].mxu1 %vm283_vm3, %v917_v23  ;;  %v1057_v24 = vpop.permute.xlu0 %1056 }
 0x251   : > { %1033 = vmatprep.mubr.bf16.mxu1 %v1746_v0 }
 0x252   : > { %v987_v27 = vpop.permute.xlu1 %986 }
 0x253   : > { %v990_v28 = vsel %vm341_vm2, %v985_v17, %v987_v27  ;;  %v991_v29 = vsel %vm341_vm2, %v987_v27, %v989_v22 }
 0x254   : > { %v996_v30 = vsel %vm287_vm1, %v990_v28, 0  ;;  %1621 = vmatprep.subr.msk.bf16.mxu1 %vm287_vm1, %v991_v29  ;;  %v1045_v31 = vpop.permute.xlu0 %1044 }
 0x255   : > { %1002 = vmatpush1.bf16.msra.mxu1 %v996_v30 }
 0x256   : > { %v1059_v32 = vpop.permute.xlu1 %1058 }
 0x257   : > { %v1061_v33 = vsel %vm412_vm4, %v1057_v24, %v1059_v32 }
 0x258   : > { %1626 = vmatprep.subr.msk.bf16.mxu1 %vm287_vm1, %v1061_v33  ;;  %v1177_v34 = vpop.permute.xlu0 %1176 }
 0x25a   : > { %v1055_v35 = vpop.permute.xlu1 %1054 }
 0x25b   : > { %v1060_v36 = vsel %vm412_vm4, %v1055_v35, %v1057_v24 }
 0x25c   : > { %v1066_v37 = vsel %vm287_vm1, %v1060_v36, 0  ;;  %1622 = vmatmul.mubr.msk.bf16.vlgmr.msra.gmra.mrb[8].mxu1 %vm283_vm3, %v1961_v10  ;;  %v1173_v40 = vpop.permute.xlu0 %1172 }
 0x25d   : > { %1072 = vmatpush1.bf16.msra.mxu1 %v1066_v37  ;;  %1103 = vmatprep.mubr.bf16.mxu1 %v1746_v0 }
 0x25e   : > { %v1175_v41 = vpop.permute.xlu1 %1174 }
 0x25f   : > { %v1180_v45 = vsel %vm533_vm7, %v1175_v41, %v1177_v34 }
 0x260   : > { %v1299_v42 = vpop.permute.xlu0 %1298  ;;  %v1186_v49 = vsel %vm287_vm1, %v1180_v45, 0 }
 0x262   : > { %v1179_v43 = vpop.permute.xlu1 %1178 }
 0x263   : > { %v1181_v44 = vsel %vm533_vm7, %v1177_v34, %v1179_v43 }
 0x264   : > { %1632 = vmatprep.subr.msk.bf16.mxu1 %vm287_vm1, %v1181_v44  ;;  %v1295_v46 = vpop.permute.xlu0 %1294 }
 0x266   : > { %v1301_v47 = vpop.permute.xlu1 %1300 }
 0x267   : > { %v1303_v48 = vsel %vm657_vm5, %v1299_v42, %v1301_v47 }
 0x268   : > { %1627 = vmatmul.mubr.msk.bf16.vlgmr.msra.gmra.mrb[8].mxu1 %vm283_vm3, %v1045_v31  ;;  %v1355_v50 = vpop.permute.xlu0 %1354 }
 0x269   : > { %1192 = vmatpush1.bf16.msra.mxu1 %v1186_v49  ;;  %1223 = vmatprep.mubr.bf16.mxu1 %v1746_v0 }
 0x26a   : > { %1636 = vmatprep.subr.msk.bf16.mxu1 %vm287_vm1, %v1303_v48  ;;  %v1297_v51 = vpop.permute.xlu1 %1296 }
 0x26b   : > { %v1302_v52 = vsel %vm657_vm5, %v1297_v51, %v1299_v42 }
 0x26c   : > { %v1359_v53 = vpop.permute.xlu0 %1358  ;;  %v1308_v55 = vsel %vm287_vm1, %v1302_v52, 0 }
 0x26e   : > { %v1116_v54 = vpop.permute.xlu1 %1115 }
 0x26f   : > { %1631 = vmatmul.mubr.msk.bf16.vlgmr.msra.gmra.mrb[12].mxu0 %vm283_vm3, %v1116_v54 }
 0x270   : > { %1633 = vmatmul.mubr.msk.bf16.vlgmr.msra.gmra.mrb[12].mxu1 %vm283_vm3, %v1173_v40  ;;  %1283 = vmatprep.mubr.bf16.mxu0 %v1746_v0  ;;  %v1239_v56 = vpop.permute.xlu0 %1238 }
 0x271   : > { %1314 = vmatpush1.bf16.msra.mxu1 %v1308_v55  ;;  %1345 = vmatprep.mubr.bf16.mxu1 %v1746_v0 }
 0x272   : > { %v1357_v57 = vpop.permute.xlu1 %1356 }
 0x273   : > { %v1362_v59 = vsel %vm718_vm6, %v1357_v57, %v1359_v53 }
 0x274   : > { %v1235_v61 = vpop.permute.xlu0 %1234  ;;  %v1368_v1 = vsel %vm287_vm1, %v1362_v59, 0 }
 0x276   : > { %v1361_v62 = vpop.permute.xlu1 %1360 }
 0x277   : > { %v1363_v63 = vsel %vm718_vm6, %v1359_v53, %v1361_v62 }
 0x278   : > { %1637 = vmatmul.mubr.msk.bf16.vlgmr.msra.gmra.mrb[16].mxu1 %vm283_vm3, %v1295_v46  ;;  %1638 = vmatprep.subr.msk.bf16.mxu1 %vm287_vm1, %v1363_v63  ;;  %v1419_v2 = vpop.permute.xlu0 %1418 }
 0x279   : > { %1374 = vmatpush1.bf16.msra.mxu1 %v1368_v1  ;;  %1405 = vmatprep.mubr.bf16.mxu1 %v1746_v0 }
 0x27a   : > { %v1237_v3 = vpop.permute.xlu1 %1236 }
 0x27b   : > { %v1240_v4 = vsel %vm594_vm8, %v1235_v61, %v1237_v3  ;;  %v1241_v5 = vsel %vm594_vm8, %v1237_v3, %v1239_v56 }
 0x27c   : > { %v1246_v6 = vsel %vm287_vm1, %v1240_v4, 0  ;;  %1634 = vmatprep.subr.msk.bf16.mxu0 %vm287_vm1, %v1241_v5  ;;  %v1233_v7 = vpop.permute.xlu0 %1232 }
 0x27d   : > { %1252 = vmatpush1.bf16.msra.mxu0 %v1246_v6 }
 0x27e   : > { %v1417_v8 = vpop.permute.xlu1 %1416 }
 0x27f   : > { %v1422_v9 = vsel %vm779_vm9, %v1417_v8, %v1419_v2 }
 0x280   : > { %1635 = vmatmul.mubr.msk.bf16.vlgmr.msra.gmra.mrb[16].mxu0 %vm283_vm3, %v1233_v7  ;;  %v1428_v12 = vsel %vm287_vm1, %v1422_v9, 0 }
 0x282   : > { %v1421_v10 = vpop.permute.xlu1 %1420 }
 0x283   : > { %v1423_v11 = vsel %vm779_vm9, %v1419_v2, %v1421_v10 }
 0x284   : > { %1639 = vmatmul.mubr.msk.bf16.vlgmr.msra.gmra.mrb[16].mxu1 %vm283_vm3, %v1355_v50  ;;  %1640 = vmatprep.subr.msk.bf16.mxu1 %vm287_vm1, %v1423_v11 }
 0x285   : > { %1434 = vmatpush1.bf16.msra.mxu1 %v1428_v12  ;;  %1465 = vmatprep.mubr.bf16.mxu1 %v1746_v0 }
 0x286   : > { %v1415_v13 = vpop.permute.xlu1 %1414 }
 0x28d   : > { %v1488_v48 = vpop.permute.xlu0 %1487 }
 0x290   : > { %1641 = vmatmul.mubr.msk.bf16.vlgmr.msra.gmra.mrb[16].mxu1 %vm283_vm3, %v1415_v13 }
 0x33b   : > { %v1105_v14 = vpop.f32.mrb[8].mxu1 }
 0x33c   : > { %v1107_v15 = vpop.f32.mrb[9].mxu1  ;;  %v1476_v31 = vmul.f32 %v1105_v14, %v1930_v25 }
 0x33d   : > { %v1109_v16 = vpop.f32.mrb[10].mxu1  ;;  %v1477_v0 = vmul.f32 %v1107_v15, %v1932_v26 }
 0x33e   : > { %v1110_v17 = vpop.f32.mrb[11].mxu1 }
 0x342   : > { %v1165_v18 = vpop.f32.mrb[12].mxu0 }
 0x343   : > { %v1225_v19 = vpop.f32.mrb[12].mxu1  ;;  %v1167_v20 = vpop.f32.mrb[13].mxu0 }
 0x344   : > { %v1226_v21 = vadd.f32 %v1225_v19, %v1165_v18  ;;  %v1227_v22 = vpop.f32.mrb[13].mxu1  ;;  %v1169_v23 = vpop.f32.mrb[14].mxu0 }
 0x345   : > { %v1228_v24 = vadd.f32 %v1227_v22, %v1167_v20  ;;  %v1229_v27 = vpop.f32.mrb[14].mxu1  ;;  %v1170_v28 = vpop.f32.mrb[15].mxu0 }
 0x346   : > { %v1230_v29 = vpop.f32.mrb[15].mxu1 }
 0x353   : > { %v1285_v30 = vpop.f32.mrb[16].mxu0 }
 0x354   : > { %v1292_v32 = vadd.f32 %v1285_v30, %v1226_v21  ;;  %v1287_v33 = vpop.f32.mrb[17].mxu0 }
 0x355   : > { %v1293_v34 = vadd.f32 %v1287_v33, %v1228_v24  ;;  %v1289_v35 = vpop.f32.mrb[18].mxu0 }
 0x356   : > { %v1478_v36 = vadd.f32 %v1476_v31, %v1292_v32  ;;  %v1290_v37 = vpop.f32.mrb[19].mxu0 }
 0x357   : > { %v1479_v40 = vadd.f32 %v1477_v0, %v1293_v34 }
 0x363   : > { %v1467_v41 = vpop.f32.mrb[16].mxu1 }
 0x364   : > { %v1480_v42 = vmul.f32 %v1467_v41, %v1939_v38  ;;  %v1469_v43 = vpop.f32.mrb[17].mxu1 }
 0x365   : > { %v1481_v44 = vmul.f32 %v1469_v43, %v1941_v39  ;;  %v1471_v45 = vpop.f32.mrb[18].mxu1 }
 0x366   : > { %v1482_v46 = vadd.f32 %v1480_v42, %v1478_v36  ;;  %v1472_v47 = vpop.f32.mrb[19].mxu1 }
 0x367   : > { %v1483_v25 = vadd.f32 %v1481_v44, %v1479_v40 }
 0x368   : > { %v1490_v49 = vadd.f32 %v1488_v48, %v1482_v46 }
 0x369   : > { %v1491_v50 = vadd.f32 %v1488_v48, %v1483_v25 }
 0x36a   : > { %v1642_v51 = vmul.f32 -1.442695, %v1490_v49 }
 0x36b   : > { %v1643_v26 = vmul.f32 -1.442695, %v1491_v50 }
 0x36c   : > { %1728 = vpow2.f32 %v1642_v51 }
 0x36d   : > { %1730 = vpow2.f32 %v1643_v26 }
 0x376   : > { %v1729_v52 = vpop.eup %1728 }
 0x377   : > { %v1731_v53 = vpop.eup %1730  ;;  %v1498_v54 = vadd.f32 1.0, %v1729_v52 }
 0x378   : > { %v1499_v55 = vadd.f32 1.0, %v1731_v53 }
 0x379   : > { %1732 = vrcp.f32 %v1498_v54 }
 0x37a   : > { %1734 = vrcp.f32 %v1499_v55 }
 0x383   : > { %v1733_v38 = vpop.eup %1732 }
 0x384   : > { %v1735_v39 = vpop.eup %1734  ;;  %v1504_v56 = vmul.f32 %v1733_v38, %v1490_v49 }
 0x385   : > { %v1505_v57 = vmul.f32 %v1735_v39, %v1491_v50 }
 0x386   : > { %v1506_v59 = vmul.f32 %v1504_v56, %v1948_v58 }
 0x387   : > { %v1507_v61 = vmul.f32 %v1505_v57, %v1950_v60 }
 0x389   : > { %v1650_v62 = vpack.c.bf16 %v1507_v61, %v1506_v59 }
 0x38b   : > { %1518 = vst [vmem:[%s2052_s9 + $0x4] sm:$0xff] %v1650_v62 }
 0x38c PF: > { %s16_s21 = sadd.s32 1, %s1744_s21  }
 0x38d   : > { %p13_p4 = scmp.ge.s32.totalorder %s16_s21, 4  }
 0x38f   :  { %15 = sbr.rel (!%p13_p4) target bundleno = 1 (0x1), region = 76 }

</bundles_post_ra>
